<compile_context>
chip_gen: v7x
topology: tpu7x:2x2x1
jax: 0.10.0
libtpu: 0.0.40
codegen_flags: <defaults>
</compile_context>

<pallas_src>
import numpy as np
import jax
import jax.numpy as jnp
from jax import lax
from jax.experimental import pallas as pl
from jax.experimental.pallas import tpu as pltpu


# ----------------------------------------------------------------------------
# Init-time parameter preparation (numpy; runs once, never in the hot path)
# ----------------------------------------------------------------------------
def _fold_bn(gamma, beta, mean, var, eps=1e-5):
    scale = gamma / np.sqrt(var + eps)
    bias = beta - mean * scale
    return scale.astype(np.float32), bias.astype(np.float32)


def _banded_conv_weight(w_hwio, w_out, pool_k=1):
    """(3,3,Cin,Cout) conv weight -> 3 banded matrices B_ky of shape
    (w_out*pool_k*Cin, w_out*Cout) such that, for activations stored as
    lane-dense rows (H, W*Cin),
        out_row[y] = sum_ky in_row[y + ky - 1] @ B_ky
    reproduces the stride-1 'same' 3x3 convolution.  Left/right zero padding is
    implicit (missing bands).  pool_k > 1 additionally folds in the column
    compaction of a fused max-pool: output column x reads the input lane block
    starting at (x*pool_k)*Cin; all other lanes get zero rows."""
    cin, cout = w_hwio.shape[2], w_hwio.shape[3]
    B = np.zeros((3, w_out * pool_k * cin, w_out * cout), np.float32)
    for ky in range(3):
        for kx in range(3):
            for xo in range(w_out):
                xi = xo + kx - 1
                if 0 <= xi < w_out:
                    r0 = xi * pool_k * cin
                    B[ky, r0:r0 + cin, xo * cout:(xo + 1) * cout] = w_hwio[ky, kx]
    return B


def _init_multiblock(key, in_channels, out_channels, n_blocks, w_out,
                     first_pool_k=1, weight_dtype=jnp.float32):
    """MultiBlockBasic: n_blocks x (conv3x3(no bias) -> BN(inference) -> ReLU),
    pre-lowered to banded conv weights + a per-lane folded-BN affine."""
    blocks = []
    cin, pool_k = in_channels, first_pool_k
    for _ in range(n_blocks):
        key, kw, kg, kb, km, kv = jax.random.split(key, 6)
        w = 0.1 * jax.random.normal(kw, (3, 3, cin, out_channels), jnp.float32)
        gamma = 1.0 + 0.1 * jax.random.normal(kg, (out_channels,), jnp.float32)
        beta = 0.05 * jax.random.normal(kb, (out_channels,), jnp.float32)
        mean = 0.02 * jax.random.normal(km, (out_channels,), jnp.float32)
        var = 1.0 + 0.1 * jnp.abs(jax.random.normal(kv, (out_channels,), jnp.float32))
        scale, bias = _fold_bn(np.asarray(gamma), np.asarray(beta),
                               np.asarray(mean), np.asarray(var))
        blocks.append({
            "Bw": jnp.asarray(_banded_conv_weight(np.asarray(w), w_out, pool_k),
                              dtype=weight_dtype),
            # packed per-lane affine: row 0 = scale, row 1 = bias  (2, W*Cout)
            "sb": np.stack([np.tile(scale, w_out), np.tile(bias, w_out)], axis=0),
        })
        cin, pool_k = out_channels, 1
    return blocks


# ----------------------------------------------------------------------------
# Fused kernel: all branches (decoder + skips), their conv chains, the fused
# max-pools and the final sum.  One grid step == NB batch images.
# ----------------------------------------------------------------------------
def _make_fused_kernel(branch_meta, nb, H, w_cout, compute_dtype):
    n_branches = len(branch_meta)
    n_blocks_total = sum(m["n_blocks"] for m in branch_meta)
    M = nb * H                                   # MXU M dimension

    def kernel(*refs):
        data_refs = refs[:n_branches]
        bw_refs = refs[n_branches:n_branches + n_blocks_total]
        sb_ref = refs[n_branches + n_blocks_total]      # (T, 2, W*Cout)
        out_ref = refs[-1]

        # Per-image boundary-row masks: the NB images are stacked along the
        # sublane/M axis, so the conv halo must not leak across image edges.
        row_ids = lax.broadcasted_iota(jnp.int32, (M, 1), 0)
        not_first = (row_ids % H) != 0
        not_last = (row_ids % H) != (H - 1)
        zero_row = jnp.zeros((1, w_cout), jnp.float32)

        total = None
        blk = 0
        for b, meta in enumerate(branch_meta):
            k = meta["pool_k"]
            cin = meta["cin"]
            lanes_in = meta["w_in"] * cin
            x = data_refs[b][...]                        # (nb, h_in, W_in*Cin)

            if k > 1:
                # Fused MaxPool2d(k): rows via grouped reshape + max, columns
                # via lane shifts.  The column compaction is folded into the
                # first banded conv weight (zero rows at non-selected lanes),
                # so the shift wrap/garbage lanes never reach the output.
                rm = jnp.max(x.reshape(nb, H, k, lanes_in), axis=2)
                rm = rm.reshape(M, lanes_in)
                y = rm
                for j in range(1, k):
                    y = jnp.maximum(y, jnp.roll(rm, shift=-j * cin, axis=1))
            else:
                y = x.reshape(M, lanes_in)

            for _ in range(meta["n_blocks"]):            # conv -> BN -> ReLU chain
                bw = bw_refs[blk]
                sb = sb_ref[blk]                         # (2, W*Cout) f32
                blk += 1
                lhs = y.astype(compute_dtype)
                # 3x3 'same' conv == 3 banded MXU matmuls over all NB*H rows
                # + two one-row shifts with per-image boundary masks.
                p0 = jnp.dot(lhs, bw[0], preferred_element_type=jnp.float32)
                p1 = jnp.dot(lhs, bw[1], preferred_element_type=jnp.float32)
                p2 = jnp.dot(lhs, bw[2], preferred_element_type=jnp.float32)
                dn = jnp.concatenate([zero_row, p0[:-1]], axis=0)   # row r <- p0[r-1]
                up = jnp.concatenate([p2[1:], zero_row], axis=0)    # row r <- p2[r+1]
                acc = (jnp.where(not_first, dn, 0.0) + p1
                       + jnp.where(not_last, up, 0.0))
                y = jnp.maximum(acc * sb[0:1, :] + sb[1:2, :], 0.0)  # folded BN + ReLU

            total = y if total is None else total + y    # running "sum skip"

        out_ref[...] = total.reshape(nb, H, w_cout).astype(out_ref.dtype)

    return kernel


# ----------------------------------------------------------------------------
# Module replica (NCHW interface to match the PyTorch module)
# ----------------------------------------------------------------------------
class Unet3pSumSkipBlockLightPallas:
    def __init__(self, in_channels, out_channel_list, skip_channel_list,
                 skip_index, out_dims, n_conv_blocks=1, key=None,
                 weight_dtype=jnp.float32):
        if key is None:
            key = jax.random.PRNGKey(0)
        current_out_chl = out_channel_list[skip_index + 1]
        skip_channels = skip_channel_list[skip_index:-1]
        out_dims_s = out_dims[skip_index:]

        self.cout = current_out_chl
        self.n_conv_blocks = n_conv_blocks
        self.target_size = out_dims_s[0]
        self.decoder_cin = in_channels
        self.compute_dtype = weight_dtype      # MXU lhs/rhs dtype; epilogue stays f32

        key, kdec = jax.random.split(key)
        self.decoder_blocks = _init_multiblock(
            kdec, in_channels, current_out_chl, n_conv_blocks, self.target_size,
            weight_dtype=weight_dtype)

        self.skip_pool_ks, self.skip_cins, self.skip_blocks = [], [], []
        if skip_channels:
            target = out_dims_s[0]
            for in_chl, out_dim in zip(skip_channels, out_dims_s):
                sf = out_dim / target
                k = int(sf) if sf > 1 else 1
                key, ks = jax.random.split(key)
                self.skip_pool_ks.append(k)
                self.skip_cins.append(in_chl)
                self.skip_blocks.append(_init_multiblock(
                    ks, in_chl, current_out_chl, n_conv_blocks, target,
                    first_pool_k=k, weight_dtype=weight_dtype))

    def __call__(self, x_nchw, idx, skips):
        N, cin0, H, W = x_nchw.shape
        assert cin0 == self.decoder_cin
        assert H == self.target_size and W == self.target_size
        w_cout = W * self.cout

        def to_rows(t):   # NCHW -> lane-dense (N, H, W*C) channels-last rows
            n, c, h, w = t.shape
            return jnp.transpose(t, (0, 2, 3, 1)).reshape(n, h, w * c).astype(jnp.float32)
        # TODO(synk): these boundary transposes are whole-array HBM round-trips;
        # at real sizes keep adjacent layers in the lane-dense (N, H, W*C) layout.

        data = [to_rows(x_nchw)]
        meta = [dict(n_blocks=self.n_conv_blocks, pool_k=1, cin=cin0, h_in=H, w_in=W)]
        chains = [self.decoder_blocks]

        if idx < len(skips):
            sk = skips[idx:]
            for i, (k, cin, blocks) in enumerate(
                    zip(self.skip_pool_ks, self.skip_cins, self.skip_blocks)):
                if i >= len(sk):
                    break
                s = sk[i]
                assert s.shape[0] == N
                _, c, h_in, w_in = s.shape
                assert c == cin
                if k > 1:
                    h_pad = -(-h_in // k) * k - h_in
                    w_pad = -(-w_in // k) * k - w_in
                    if h_pad or w_pad:
                        # TODO(synk): MaxPool2d(ceil_mode=True) partial windows handled by
                        # a very-negative finite pad (so 0*pad stays 0 in the banded matmul).
                        s = jnp.pad(s, ((0, 0), (0, 0), (0, h_pad), (0, w_pad)),
                                    constant_values=-1e30)
                    h_in, w_in = h_in + h_pad, w_in + w_pad
                    assert h_in // k == H and w_in // k == W, \
                        "pooled skip must land on the target spatial size"
                else:
                    assert h_in == H and w_in == W
                data.append(to_rows(s))
                meta.append(dict(n_blocks=self.n_conv_blocks, pool_k=k, cin=cin,
                                 h_in=h_in, w_in=w_in))
                chains.append(blocks)

        # Parameters: one banded-weight array per conv block + ONE packed
        # scale/bias operand for every block (cuts tiny-operand DMA/descriptor
        # overhead and padded VMEM tiles).
        bw_params, sb_rows = [], []
        for chain in chains:
            for blkp in chain:
                bw_params.append(blkp["Bw"])
                sb_rows.append(blkp["sb"])
        sb_all = jnp.asarray(np.stack(sb_rows, axis=0))   # (T, 2, W*Cout) f32

        # Images per grid step: stack NB images along the MXU M dim (M = NB*H,
        # aim 64-128 rows) to amortize weight pushes + per-step overhead.
        # On v7x prefer keeping N//nb >= 2 so both TensorCores get work.
        nb_cap = max(1, 128 // H)
        nb = 1
        for cand in range(min(N, nb_cap), 0, -1):
            if N % cand == 0:
                nb = cand
                break
        grid = (N // nb,)

        in_specs = [pl.BlockSpec((nb, m["h_in"], m["w_in"] * m["cin"]),
                                 lambda g: (g, 0, 0)) for m in meta]
        in_specs += [pl.BlockSpec(p.shape, lambda g: (0, 0, 0)) for p in bw_params]
        in_specs += [pl.BlockSpec(sb_all.shape, lambda g: (0, 0, 0))]

        out = pl.pallas_call(
            _make_fused_kernel(meta, nb, H, w_cout, self.compute_dtype),
            out_shape=jax.ShapeDtypeStruct((N, H, w_cout), jnp.float32),
            grid=grid,
            in_specs=in_specs,
            out_specs=pl.BlockSpec((nb, H, w_cout), lambda g: (g, 0, 0)),
            compiler_params=pltpu.CompilerParams(
                dimension_semantics=("parallel",)),   # v7x: grid steps split across TCs
        )(*data, *bw_params, sb_all)

        out = out.reshape(N, H, W, self.cout)
        return jnp.transpose(out, (0, 3, 1, 2)), None   # rows -> NCHW


if __name__ == "__main__":
    key = jax.random.PRNGKey(0)
    kx, ks0, ks1, kp = jax.random.split(key, 4)

    # Module config (exercises both the Identity and the MaxPool2d(2) skip path):
    #   current_out_chl = out_channel_list[skip_index + 1] = 8
    #   skip_channels   = skip_channel_list[1:-1] = [6, 8]
    #   out_dims sliced = [16, 32, 64] -> target 16 -> scales: Identity, MaxPool2d(2)
    in_channels = 4
    out_channel_list = [16, 8, 8, 8]
    skip_channel_list = [4, 6, 8, 16]
    skip_index = 1
    out_dims = [8, 16, 32, 64]

    module = Unet3pSumSkipBlockLightPallas(
        in_channels, out_channel_list, skip_channel_list, skip_index, out_dims,
        n_conv_blocks=1, key=kp)

    N = 2
    x = jax.random.normal(kx, (N, in_channels, 16, 16), jnp.float32)   # decoder feat (NCHW)
    skip0 = jax.random.normal(ks0, (N, 6, 16, 16), jnp.float32)        # encoder skip @ 16x16
    skip1 = jax.random.normal(ks1, (N, 8, 32, 32), jnp.float32)        # encoder skip @ 32x32

    fwd = jax.jit(lambda a, b, c: module(a, 0, (b, c)))   # fuses the boundary transposes
    out, none_ret = fwd(x, skip0, skip1)
    jax.block_until_ready(out)
    assert out.shape == (N, 8, 16, 16) and none_ret is None
    print("KERNEL_OK")
</pallas_src>

<mosaic_0001>
module attributes {stable_mosaic.version = 11 : i64} {
  func.func @kernel(%arg0: i32, %arg1: memref<2x16x64xf32, #tpu.memory_space<vmem>>, %arg2: memref<2x16x96xf32, #tpu.memory_space<vmem>>, %arg3: memref<2x32x256xf32, #tpu.memory_space<vmem>>, %arg4: memref<3x64x128xf32, #tpu.memory_space<vmem>>, %arg5: memref<3x96x128xf32, #tpu.memory_space<vmem>>, %arg6: memref<3x256x128xf32, #tpu.memory_space<vmem>>, %arg7: memref<3x2x128xf32, #tpu.memory_space<vmem>>, %arg8: memref<2x16x128xf32, #tpu.memory_space<vmem>>) attributes {dimension_semantics = [#tpu.dimension_semantics<parallel>], iteration_bounds = array<i64: 1>, scalar_prefetch = 0 : i64, scratch_operands = 0 : i64, tpu.core_type = #tpu.core_type<tc>, window_params = [{transform_indices = @transform_0, window_bounds = array<i64: 2, 16, 64>}, {transform_indices = @transform_1, window_bounds = array<i64: 2, 16, 96>}, {transform_indices = @transform_2, window_bounds = array<i64: 2, 32, 256>}, {pipeline_mode = #tpu.pipeline_mode<synchronous>, transform_indices = @transform_3, window_bounds = array<i64: 3, 64, 128>}, {pipeline_mode = #tpu.pipeline_mode<synchronous>, transform_indices = @transform_4, window_bounds = array<i64: 3, 96, 128>}, {pipeline_mode = #tpu.pipeline_mode<synchronous>, transform_indices = @transform_5, window_bounds = array<i64: 3, 256, 128>}, {pipeline_mode = #tpu.pipeline_mode<synchronous>, transform_indices = @transform_6, window_bounds = array<i64: 3, 2, 128>}, {transform_indices = @transform_7, window_bounds = array<i64: 2, 16, 128>}]} {
    %0 = tpu.iota {dimensions = array<i32: 0>} : vector<32x1xi32>
    %c16_i32 = arith.constant 16 : i32
    %c0_i32 = arith.constant 0 : i32
    %1 = arith.cmpi eq, %c16_i32, %c0_i32 : i32
    %c1_i32 = arith.constant 1 : i32
    %2 = arith.select %1, %c1_i32, %c16_i32 : i32
    %3 = vector.broadcast %2 : i32 to vector<32x1xi32>
    %4 = arith.remsi %0, %3 : vector<32x1xi32>
    %c0_i32_0 = arith.constant 0 : i32
    %5 = vector.broadcast %c0_i32_0 : i32 to vector<32x1xi32>
    %6 = arith.cmpi ne, %4, %5 : vector<32x1xi32>
    %c0_i32_1 = arith.constant 0 : i32
    %7 = vector.broadcast %c0_i32_1 : i32 to vector<32x1xi32>
    %8 = arith.cmpi slt, %4, %7 : vector<32x1xi32>
    %c0_i32_2 = arith.constant 0 : i32
    %9 = arith.cmpi slt, %2, %c0_i32_2 : i32
    %10 = vector.broadcast %9 : i1 to vector<32x1xi1>
    %11 = vector.broadcast %10 : vector<32x1xi1> to vector<32x1xi1>
    %12 = arith.xori %8, %11 : vector<32x1xi1>
    %13 = arith.andi %12, %6 : vector<32x1xi1>
    %14 = vector.broadcast %2 : i32 to vector<32x1xi32>
    %15 = arith.addi %4, %14 : vector<32x1xi32>
    %16 = arith.select %13, %15, %4 : vector<32x1xi1>, vector<32x1xi32>
    %c0_i32_3 = arith.constant 0 : i32
    %17 = vector.broadcast %c0_i32_3 : i32 to vector<32x1xi32>
    %18 = arith.cmpi ne, %16, %17 : vector<32x1xi32>
    %c16_i32_4 = arith.constant 16 : i32
    %c0_i32_5 = arith.constant 0 : i32
    %19 = arith.cmpi eq, %c16_i32_4, %c0_i32_5 : i32
    %c1_i32_6 = arith.constant 1 : i32
    %20 = arith.select %19, %c1_i32_6, %c16_i32_4 : i32
    %21 = vector.broadcast %20 : i32 to vector<32x1xi32>
    %22 = arith.remsi %0, %21 : vector<32x1xi32>
    %c0_i32_7 = arith.constant 0 : i32
    %23 = vector.broadcast %c0_i32_7 : i32 to vector<32x1xi32>
    %24 = arith.cmpi ne, %22, %23 : vector<32x1xi32>
    %c0_i32_8 = arith.constant 0 : i32
    %25 = vector.broadcast %c0_i32_8 : i32 to vector<32x1xi32>
    %26 = arith.cmpi slt, %22, %25 : vector<32x1xi32>
    %c0_i32_9 = arith.constant 0 : i32
    %27 = arith.cmpi slt, %20, %c0_i32_9 : i32
    %28 = vector.broadcast %27 : i1 to vector<32x1xi1>
    %29 = vector.broadcast %28 : vector<32x1xi1> to vector<32x1xi1>
    %30 = arith.xori %26, %29 : vector<32x1xi1>
    %31 = arith.andi %30, %24 : vector<32x1xi1>
    %32 = vector.broadcast %20 : i32 to vector<32x1xi32>
    %33 = arith.addi %22, %32 : vector<32x1xi32>
    %34 = arith.select %31, %33, %22 : vector<32x1xi1>, vector<32x1xi32>
    %c15_i32 = arith.constant 15 : i32
    %35 = vector.broadcast %c15_i32 : i32 to vector<32x1xi32>
    %36 = arith.cmpi ne, %34, %35 : vector<32x1xi32>
    %cst = arith.constant 0.000000e+00 : f32
    %37 = vector.broadcast %cst : f32 to vector<1x128xf32>
    %c0 = arith.constant 0 : index
    %c0_10 = arith.constant 0 : index
    %c0_11 = arith.constant 0 : index
    %38 = vector.load %arg1[%c0, %c0_10, %c0_11] : memref<2x16x64xf32, #tpu.memory_space<vmem>>, vector<2x16x64xf32>
    %39 = vector.shape_cast %38 : vector<2x16x64xf32> to vector<32x64xf32>
    %c0_12 = arith.constant 0 : index
    %c0_13 = arith.constant 0 : index
    %c0_14 = arith.constant 0 : index
    %40 = vector.load %arg7[%c0_12, %c0_13, %c0_14] : memref<3x2x128xf32, #tpu.memory_space<vmem>>, vector<1x2x128xf32>
    %41 = vector.shape_cast %40 : vector<1x2x128xf32> to vector<2x128xf32>
    %c0_15 = arith.constant 0 : index
    %c0_16 = arith.constant 0 : index
    %c0_17 = arith.constant 0 : index
    %42 = vector.load %arg4[%c0_15, %c0_16, %c0_17] : memref<3x64x128xf32, #tpu.memory_space<vmem>>, vector<1x64x128xf32>
    %43 = vector.shape_cast %42 : vector<1x64x128xf32> to vector<64x128xf32>
    %cst_18 = arith.constant dense<0.000000e+00> : vector<32x128xf32>
    %44 = tpu.matmul %39, %43, %cst_18 {dimension_numbers = #tpu.dot_dimension_numbers<[1], [0], [0], [1], [0, 0, 1, 1], [], []>} : vector<32x64xf32>, vector<64x128xf32>, vector<32x128xf32> -> vector<32x128xf32>
    %c1 = arith.constant 1 : index
    %c0_19 = arith.constant 0 : index
    %c0_20 = arith.constant 0 : index
    %45 = vector.load %arg4[%c1, %c0_19, %c0_20] : memref<3x64x128xf32, #tpu.memory_space<vmem>>, vector<1x64x128xf32>
    %46 = vector.shape_cast %45 : vector<1x64x128xf32> to vector<64x128xf32>
    %cst_21 = arith.constant dense<0.000000e+00> : vector<32x128xf32>
    %47 = tpu.matmul %39, %46, %cst_21 {dimension_numbers = #tpu.dot_dimension_numbers<[1], [0], [0], [1], [0, 0, 1, 1], [], []>} : vector<32x64xf32>, vector<64x128xf32>, vector<32x128xf32> -> vector<32x128xf32>
    %c2 = arith.constant 2 : index
    %c0_22 = arith.constant 0 : index
    %c0_23 = arith.constant 0 : index
    %48 = vector.load %arg4[%c2, %c0_22, %c0_23] : memref<3x64x128xf32, #tpu.memory_space<vmem>>, vector<1x64x128xf32>
    %49 = vector.shape_cast %48 : vector<1x64x128xf32> to vector<64x128xf32>
    %cst_24 = arith.constant dense<0.000000e+00> : vector<32x128xf32>
    %50 = tpu.matmul %39, %49, %cst_24 {dimension_numbers = #tpu.dot_dimension_numbers<[1], [0], [0], [1], [0, 0, 1, 1], [], []>} : vector<32x64xf32>, vector<64x128xf32>, vector<32x128xf32> -> vector<32x128xf32>
    %51 = vector.extract_strided_slice %44 {offsets = [0, 0], sizes = [31, 128], strides = [1, 1]} : vector<32x128xf32> to vector<31x128xf32>
    %52 = tpu.concatenate %37, %51 in 0 : vector<1x128xf32>, vector<31x128xf32> -> vector<32x128xf32>
    %53 = vector.extract_strided_slice %50 {offsets = [1, 0], sizes = [31, 128], strides = [1, 1]} : vector<32x128xf32> to vector<31x128xf32>
    %54 = tpu.concatenate %53, %37 in 0 : vector<31x128xf32>, vector<1x128xf32> -> vector<32x128xf32>
    %cst_25 = arith.constant 0.000000e+00 : f32
    %55 = vector.shape_cast %18 : vector<32x1xi1> to vector<32x1xi1>
    %56 = vector.broadcast %55 : vector<32x1xi1> to vector<32x128xi1>
    %57 = vector.broadcast %cst_25 : f32 to vector<32x128xf32>
    %58 = arith.select %56, %52, %57 : vector<32x128xi1>, vector<32x128xf32>
    %59 = arith.addf %58, %47 : vector<32x128xf32>
    %cst_26 = arith.constant 0.000000e+00 : f32
    %60 = vector.shape_cast %36 : vector<32x1xi1> to vector<32x1xi1>
    %61 = vector.broadcast %60 : vector<32x1xi1> to vector<32x128xi1>
    %62 = vector.broadcast %cst_26 : f32 to vector<32x128xf32>
    %63 = arith.select %61, %54, %62 : vector<32x128xi1>, vector<32x128xf32>
    %64 = arith.addf %59, %63 : vector<32x128xf32>
    %65 = vector.extract_strided_slice %41 {offsets = [0, 0], sizes = [1, 128], strides = [1, 1]} : vector<2x128xf32> to vector<1x128xf32>
    %66 = vector.broadcast %65 : vector<1x128xf32> to vector<32x128xf32>
    %67 = arith.mulf %64, %66 : vector<32x128xf32>
    %68 = vector.extract_strided_slice %41 {offsets = [1, 0], sizes = [1, 128], strides = [1, 1]} : vector<2x128xf32> to vector<1x128xf32>
    %69 = vector.broadcast %68 : vector<1x128xf32> to vector<32x128xf32>
    %70 = arith.addf %67, %69 : vector<32x128xf32>
    %cst_27 = arith.constant 0.000000e+00 : f32
    %71 = vector.broadcast %cst_27 : f32 to vector<32x128xf32>
    %72 = arith.maximumf %70, %71 : vector<32x128xf32>
    %c0_28 = arith.constant 0 : index
    %c0_29 = arith.constant 0 : index
    %c0_30 = arith.constant 0 : index
    %73 = vector.load %arg2[%c0_28, %c0_29, %c0_30] : memref<2x16x96xf32, #tpu.memory_space<vmem>>, vector<2x16x96xf32>
    %74 = vector.shape_cast %73 : vector<2x16x96xf32> to vector<32x96xf32>
    %c1_31 = arith.constant 1 : index
    %c0_32 = arith.constant 0 : index
    %c0_33 = arith.constant 0 : index
    %75 = vector.load %arg7[%c1_31, %c0_32, %c0_33] : memref<3x2x128xf32, #tpu.memory_space<vmem>>, vector<1x2x128xf32>
    %76 = vector.shape_cast %75 : vector<1x2x128xf32> to vector<2x128xf32>
    %c0_34 = arith.constant 0 : index
    %c0_35 = arith.constant 0 : index
    %c0_36 = arith.constant 0 : index
    %77 = vector.load %arg5[%c0_34, %c0_35, %c0_36] : memref<3x96x128xf32, #tpu.memory_space<vmem>>, vector<1x96x128xf32>
    %78 = vector.shape_cast %77 : vector<1x96x128xf32> to vector<96x128xf32>
    %cst_37 = arith.constant dense<0.000000e+00> : vector<32x128xf32>
    %79 = tpu.matmul %74, %78, %cst_37 {dimension_numbers = #tpu.dot_dimension_numbers<[1], [0], [0], [1], [0, 0, 1, 1], [], []>} : vector<32x96xf32>, vector<96x128xf32>, vector<32x128xf32> -> vector<32x128xf32>
    %c1_38 = arith.constant 1 : index
    %c0_39 = arith.constant 0 : index
    %c0_40 = arith.constant 0 : index
    %80 = vector.load %arg5[%c1_38, %c0_39, %c0_40] : memref<3x96x128xf32, #tpu.memory_space<vmem>>, vector<1x96x128xf32>
    %81 = vector.shape_cast %80 : vector<1x96x128xf32> to vector<96x128xf32>
    %cst_41 = arith.constant dense<0.000000e+00> : vector<32x128xf32>
    %82 = tpu.matmul %74, %81, %cst_41 {dimension_numbers = #tpu.dot_dimension_numbers<[1], [0], [0], [1], [0, 0, 1, 1], [], []>} : vector<32x96xf32>, vector<96x128xf32>, vector<32x128xf32> -> vector<32x128xf32>
    %c2_42 = arith.constant 2 : index
    %c0_43 = arith.constant 0 : index
    %c0_44 = arith.constant 0 : index
    %83 = vector.load %arg5[%c2_42, %c0_43, %c0_44] : memref<3x96x128xf32, #tpu.memory_space<vmem>>, vector<1x96x128xf32>
    %84 = vector.shape_cast %83 : vector<1x96x128xf32> to vector<96x128xf32>
    %cst_45 = arith.constant dense<0.000000e+00> : vector<32x128xf32>
    %85 = tpu.matmul %74, %84, %cst_45 {dimension_numbers = #tpu.dot_dimension_numbers<[1], [0], [0], [1], [0, 0, 1, 1], [], []>} : vector<32x96xf32>, vector<96x128xf32>, vector<32x128xf32> -> vector<32x128xf32>
    %86 = vector.extract_strided_slice %79 {offsets = [0, 0], sizes = [31, 128], strides = [1, 1]} : vector<32x128xf32> to vector<31x128xf32>
    %87 = tpu.concatenate %37, %86 in 0 : vector<1x128xf32>, vector<31x128xf32> -> vector<32x128xf32>
    %88 = vector.extract_strided_slice %85 {offsets = [1, 0], sizes = [31, 128], strides = [1, 1]} : vector<32x128xf32> to vector<31x128xf32>
    %89 = tpu.concatenate %88, %37 in 0 : vector<31x128xf32>, vector<1x128xf32> -> vector<32x128xf32>
    %cst_46 = arith.constant 0.000000e+00 : f32
    %90 = vector.shape_cast %18 : vector<32x1xi1> to vector<32x1xi1>
    %91 = vector.broadcast %90 : vector<32x1xi1> to vector<32x128xi1>
    %92 = vector.broadcast %cst_46 : f32 to vector<32x128xf32>
    %93 = arith.select %91, %87, %92 : vector<32x128xi1>, vector<32x128xf32>
    %94 = arith.addf %93, %82 : vector<32x128xf32>
    %cst_47 = arith.constant 0.000000e+00 : f32
    %95 = vector.shape_cast %36 : vector<32x1xi1> to vector<32x1xi1>
    %96 = vector.broadcast %95 : vector<32x1xi1> to vector<32x128xi1>
    %97 = vector.broadcast %cst_47 : f32 to vector<32x128xf32>
    %98 = arith.select %96, %89, %97 : vector<32x128xi1>, vector<32x128xf32>
    %99 = arith.addf %94, %98 : vector<32x128xf32>
    %100 = vector.extract_strided_slice %76 {offsets = [0, 0], sizes = [1, 128], strides = [1, 1]} : vector<2x128xf32> to vector<1x128xf32>
    %101 = vector.broadcast %100 : vector<1x128xf32> to vector<32x128xf32>
    %102 = arith.mulf %99, %101 : vector<32x128xf32>
    %103 = vector.extract_strided_slice %76 {offsets = [1, 0], sizes = [1, 128], strides = [1, 1]} : vector<2x128xf32> to vector<1x128xf32>
    %104 = vector.broadcast %103 : vector<1x128xf32> to vector<32x128xf32>
    %105 = arith.addf %102, %104 : vector<32x128xf32>
    %cst_48 = arith.constant 0.000000e+00 : f32
    %106 = vector.broadcast %cst_48 : f32 to vector<32x128xf32>
    %107 = arith.maximumf %105, %106 : vector<32x128xf32>
    %108 = arith.addf %72, %107 : vector<32x128xf32>
    %c0_49 = arith.constant 0 : index
    %c0_50 = arith.constant 0 : index
    %c0_51 = arith.constant 0 : index
    %109 = vector.load %arg3[%c0_49, %c0_50, %c0_51] : memref<2x32x256xf32, #tpu.memory_space<vmem>>, vector<2x32x256xf32>
    %110 = vector.shape_cast %109 : vector<2x32x256xf32> to vector<2x16x2x256xf32>
    %cst_52 = arith.constant dense<0xFF800000> : vector<2x16x256xf32>
    %111 = vector.multi_reduction <maximumf>, %110, %cst_52 [2] : vector<2x16x2x256xf32> to vector<2x16x256xf32>
    %112 = vector.shape_cast %111 : vector<2x16x256xf32> to vector<32x256xf32>
    %113 = vector.extract_strided_slice %112 {offsets = [0, 8], sizes = [32, 248], strides = [1, 1]} : vector<32x256xf32> to vector<32x248xf32>
    %114 = vector.extract_strided_slice %112 {offsets = [0, 0], sizes = [32, 8], strides = [1, 1]} : vector<32x256xf32> to vector<32x8xf32>
    %115 = tpu.concatenate %113, %114 in 1 : vector<32x248xf32>, vector<32x8xf32> -> vector<32x256xf32>
    %116 = arith.maximumf %112, %115 : vector<32x256xf32>
    %c2_53 = arith.constant 2 : index
    %c0_54 = arith.constant 0 : index
    %c0_55 = arith.constant 0 : index
    %117 = vector.load %arg7[%c2_53, %c0_54, %c0_55] : memref<3x2x128xf32, #tpu.memory_space<vmem>>, vector<1x2x128xf32>
    %118 = vector.shape_cast %117 : vector<1x2x128xf32> to vector<2x128xf32>
    %c0_56 = arith.constant 0 : index
    %c0_57 = arith.constant 0 : index
    %c0_58 = arith.constant 0 : index
    %119 = vector.load %arg6[%c0_56, %c0_57, %c0_58] : memref<3x256x128xf32, #tpu.memory_space<vmem>>, vector<1x256x128xf32>
    %120 = vector.shape_cast %119 : vector<1x256x128xf32> to vector<256x128xf32>
    %cst_59 = arith.constant dense<0.000000e+00> : vector<32x128xf32>
    %121 = tpu.matmul %116, %120, %cst_59 {dimension_numbers = #tpu.dot_dimension_numbers<[1], [0], [0], [1], [0, 0, 1, 1], [], []>} : vector<32x256xf32>, vector<256x128xf32>, vector<32x128xf32> -> vector<32x128xf32>
    %c1_60 = arith.constant 1 : index
    %c0_61 = arith.constant 0 : index
    %c0_62 = arith.constant 0 : index
    %122 = vector.load %arg6[%c1_60, %c0_61, %c0_62] : memref<3x256x128xf32, #tpu.memory_space<vmem>>, vector<1x256x128xf32>
    %123 = vector.shape_cast %122 : vector<1x256x128xf32> to vector<256x128xf32>
    %cst_63 = arith.constant dense<0.000000e+00> : vector<32x128xf32>
    %124 = tpu.matmul %116, %123, %cst_63 {dimension_numbers = #tpu.dot_dimension_numbers<[1], [0], [0], [1], [0, 0, 1, 1], [], []>} : vector<32x256xf32>, vector<256x128xf32>, vector<32x128xf32> -> vector<32x128xf32>
    %c2_64 = arith.constant 2 : index
    %c0_65 = arith.constant 0 : index
    %c0_66 = arith.constant 0 : index
    %125 = vector.load %arg6[%c2_64, %c0_65, %c0_66] : memref<3x256x128xf32, #tpu.memory_space<vmem>>, vector<1x256x128xf32>
    %126 = vector.shape_cast %125 : vector<1x256x128xf32> to vector<256x128xf32>
    %cst_67 = arith.constant dense<0.000000e+00> : vector<32x128xf32>
    %127 = tpu.matmul %116, %126, %cst_67 {dimension_numbers = #tpu.dot_dimension_numbers<[1], [0], [0], [1], [0, 0, 1, 1], [], []>} : vector<32x256xf32>, vector<256x128xf32>, vector<32x128xf32> -> vector<32x128xf32>
    %128 = vector.extract_strided_slice %121 {offsets = [0, 0], sizes = [31, 128], strides = [1, 1]} : vector<32x128xf32> to vector<31x128xf32>
    %129 = tpu.concatenate %37, %128 in 0 : vector<1x128xf32>, vector<31x128xf32> -> vector<32x128xf32>
    %130 = vector.extract_strided_slice %127 {offsets = [1, 0], sizes = [31, 128], strides = [1, 1]} : vector<32x128xf32> to vector<31x128xf32>
    %131 = tpu.concatenate %130, %37 in 0 : vector<31x128xf32>, vector<1x128xf32> -> vector<32x128xf32>
    %cst_68 = arith.constant 0.000000e+00 : f32
    %132 = vector.shape_cast %18 : vector<32x1xi1> to vector<32x1xi1>
    %133 = vector.broadcast %132 : vector<32x1xi1> to vector<32x128xi1>
    %134 = vector.broadcast %cst_68 : f32 to vector<32x128xf32>
    %135 = arith.select %133, %129, %134 : vector<32x128xi1>, vector<32x128xf32>
    %136 = arith.addf %135, %124 : vector<32x128xf32>
    %cst_69 = arith.constant 0.000000e+00 : f32
    %137 = vector.shape_cast %36 : vector<32x1xi1> to vector<32x1xi1>
    %138 = vector.broadcast %137 : vector<32x1xi1> to vector<32x128xi1>
    %139 = vector.broadcast %cst_69 : f32 to vector<32x128xf32>
    %140 = arith.select %138, %131, %139 : vector<32x128xi1>, vector<32x128xf32>
    %141 = arith.addf %136, %140 : vector<32x128xf32>
    %142 = vector.extract_strided_slice %118 {offsets = [0, 0], sizes = [1, 128], strides = [1, 1]} : vector<2x128xf32> to vector<1x128xf32>
    %143 = vector.broadcast %142 : vector<1x128xf32> to vector<32x128xf32>
    %144 = arith.mulf %141, %143 : vector<32x128xf32>
    %145 = vector.extract_strided_slice %118 {offsets = [1, 0], sizes = [1, 128], strides = [1, 1]} : vector<2x128xf32> to vector<1x128xf32>
    %146 = vector.broadcast %145 : vector<1x128xf32> to vector<32x128xf32>
    %147 = arith.addf %144, %146 : vector<32x128xf32>
    %cst_70 = arith.constant 0.000000e+00 : f32
    %148 = vector.broadcast %cst_70 : f32 to vector<32x128xf32>
    %149 = arith.maximumf %147, %148 : vector<32x128xf32>
    %150 = arith.addf %108, %149 : vector<32x128xf32>
    %151 = vector.shape_cast %150 : vector<32x128xf32> to vector<2x16x128xf32>
    %c0_71 = arith.constant 0 : index
    %c0_72 = arith.constant 0 : index
    %c0_73 = arith.constant 0 : index
    %152 = vector.load %arg8[%c0_71, %c0_72, %c0_73] : memref<2x16x128xf32, #tpu.memory_space<vmem>>, vector<2x16x128xf32>
    tpu.vector_store %arg8[%c0_71, %c0_72, %c0_73], %151 {strides = array<i32>} : memref<2x16x128xf32, #tpu.memory_space<vmem>>, vector<2x16x128xf32>,
    return
  }
  func.func @transform_0(%arg0: i32) -> (i32, i32, i32) {
    %c0_i32 = arith.constant 0 : i32
    %c0_i32_0 = arith.constant 0 : i32
    %c0_i32_1 = arith.constant 0 : i32
    return %arg0, %c0_i32, %c0_i32_0 : i32, i32, i32
  }
  func.func @transform_1(%arg0: i32) -> (i32, i32, i32) {
    %c0_i32 = arith.constant 0 : i32
    %c0_i32_0 = arith.constant 0 : i32
    %c0_i32_1 = arith.constant 0 : i32
    return %arg0, %c0_i32, %c0_i32_0 : i32, i32, i32
  }
  func.func @transform_2(%arg0: i32) -> (i32, i32, i32) {
    %c0_i32 = arith.constant 0 : i32
    %c0_i32_0 = arith.constant 0 : i32
    %c0_i32_1 = arith.constant 0 : i32
    return %arg0, %c0_i32, %c0_i32_0 : i32, i32, i32
  }
  func.func @transform_3(%arg0: i32) -> (i32, i32, i32) {
    %c0_i32 = arith.constant 0 : i32
    %c0_i32_0 = arith.constant 0 : i32
    %c0_i32_1 = arith.constant 0 : i32
    %c0_i32_2 = arith.constant 0 : i32
    return %c0_i32, %c0_i32_0, %c0_i32_1 : i32, i32, i32
  }
  func.func @transform_4(%arg0: i32) -> (i32, i32, i32) {
    %c0_i32 = arith.constant 0 : i32
    %c0_i32_0 = arith.constant 0 : i32
    %c0_i32_1 = arith.constant 0 : i32
    %c0_i32_2 = arith.constant 0 : i32
    return %c0_i32, %c0_i32_0, %c0_i32_1 : i32, i32, i32
  }
  func.func @transform_5(%arg0: i32) -> (i32, i32, i32) {
    %c0_i32 = arith.constant 0 : i32
    %c0_i32_0 = arith.constant 0 : i32
    %c0_i32_1 = arith.constant 0 : i32
    %c0_i32_2 = arith.constant 0 : i32
    return %c0_i32, %c0_i32_0, %c0_i32_1 : i32, i32, i32
  }
  func.func @transform_6(%arg0: i32) -> (i32, i32, i32) {
    %c0_i32 = arith.constant 0 : i32
    %c0_i32_0 = arith.constant 0 : i32
    %c0_i32_1 = arith.constant 0 : i32
    %c0_i32_2 = arith.constant 0 : i32
    return %c0_i32, %c0_i32_0, %c0_i32_1 : i32, i32, i32
  }
  func.func @transform_7(%arg0: i32) -> (i32, i32, i32) {
    %c0_i32 = arith.constant 0 : i32
    %c0_i32_0 = arith.constant 0 : i32
    %c0_i32_1 = arith.constant 0 : i32
    return %arg0, %c0_i32, %c0_i32_0 : i32, i32, i32
  }
}

</mosaic_0001>

<bundles_post_ra>
// kernel: _lambda_.1
= control target key start
LH: loop header
LB: loop body
LE: loop exit
PB: predicated region body
PF: predicated region fallthrough
CT: control target
= control target key end

     0   :  { %v26_v0 = vlaneseq  ;;  %v3535_v4 = vmov 1983009808   ;;  %vm100_vm0 = vcmask 523264   ;;  %vm1352_vm1 = vcmask 1041408   ;;  %s3536_s22 = smov 120   ;;  %s5245_s3 = inlined_call_operand.vmem [shape: f32[3,64,128], index: 3, kind: input, shape index: {}]   ;;  %s5246_s2 = inlined_call_operand.vmem [shape: f32[2,32,256], index: 2, kind: input, shape index: {}]   ;;  %s5247_s0 = inlined_call_operand.vmem [shape: f32[2,16,64], index: 0, kind: input, shape index: {}]   ;;  %s5248_s4 = inlined_call_operand.vmem [shape: f32[3,96,128], index: 4, kind: input, shape index: {}]   ;;  %s5249_s1 = inlined_call_operand.vmem [shape: f32[2,16,96], index: 1, kind: input, shape index: {}]   ;;  %s5250_s5 = inlined_call_operand.vmem [shape: f32[3,256,128], index: 5, kind: input, shape index: {}]   ;;  %s5251_s6 = inlined_call_operand.vmem [shape: f32[3,2,128], index: 6, kind: input, shape index: {}]   ;;  %s5252_s7 = inlined_call_operand.vmem [shape: f32[2,16,128], index: 7, kind: output, shape index: {}]  }
   0x1   :  { %v92_v1 = vld [vmem:[%s5245_s3] sm:$0xff]  ;;  %v93_v2 = vld [vmem:[%s5245_s3 + $0x8] sm:$0xff]  ;;  %v94_v3 = vld [vmem:[%s5245_s3 + $0x10] sm:$0xff]  ;;  %v891_v5 = vunpack.c.l.s4 %v3535_v4  ;;  %vm1865_vm2 = vcmask 1041409   ;;  %vm1867_vm3 = vcmask 1042434   ;;  %vm1869_vm4 = vcmask 1043459  }
   0x2   :  { %v3270_v6 = vpack.c.bf16 %v93_v2, %v92_v1  ;;  %v95_v7 = vld [vmem:[%s5245_s3 + $0x18] sm:$0xff]  ;;  %v96_v8 = vld [vmem:[%s5245_s3 + $0x20] sm:$0xff]  ;;  %v97_v9 = vld [vmem:[%s5245_s3 + $0x28] sm:$0xff]  ;;  %v3595_v10 = vshrl.u32 %v26_v0, 7  ;;  %vm1871_vm5 = vcmask 1044484   ;;  %vm1873_vm6 = vcmask 1045509  }
   0x3   :  { %v3274_v11 = vpack.c.bf16 %v95_v7, %v94_v3  ;;  %v98_v12 = vld [vmem:[%s5245_s3 + $0x30] sm:$0xff]  ;;  %v99_v13 = vld [vmem:[%s5245_s3 + $0x38] sm:$0xff]  ;;  %v892_v14 = vunpack.c.0.s8 %v891_v5  ;;  %v3508_v15 = vld [vmem:[%s5246_s2] ss:$8 sps:$4 sm:$0xff]   ;;  %v3278_v19 = vpack.c.bf16 %v97_v9, %v96_v8  ;;  %vm1875_vm7 = vcmask 1046534  }
   0x4   :  { %5306 = vst [vmem:[#allocation2_spill] sm:$0xff] %v3595_v10  ;;  %3271 = vmatprep.subr.bf16.mxu1 %v3270_v6  ;;  %v3510_v16 = vld [vmem:[%s5246_s2 + $0x4] ss:$8 sps:$4 sm:$0xff]   ;;  %v3511_v18 = vld [vmem:[%s5246_s2 + $0x10] ss:$8 sps:$4 sm:$0xff]   ;;  %v3282_v27 = vpack.c.bf16 %v99_v13, %v98_v12  ;;  %vm1877_vm8 = vcmask 1047559  }
   0x5   :  { %3273 = vmatpush3.bf16.msra.mxu1 %v3270_v6  ;;  %v3610_v17 = vsub.s32 %v892_v14, %v3595_v10  ;;  %v3513_v20 = vld [vmem:[%s5246_s2 + $0x14] ss:$8 sps:$4 sm:$0xff]   ;;  %v3621_v21 = vld [vmem:[%s5247_s0] sm:$0xff]  ;;  %v2773_v26 = vld [vmem:[%s5245_s3 + $0x48] sm:$0xff]  ;;  %vm490_vm9 = vcmask 785408   ;;  %vm1944_vm10 = vcmask 982016  }
   0x6   :  { %3275 = vmatprep.subr.bf16.mxu1 %v3274_v11  ;;  %v2772_v22 = vld [vmem:[%s5245_s3 + $0x40] sm:$0xff]  ;;  %3130 = vmatprep.mubr.msk.f32.mxu1 %vm100_vm0, %v3621_v21  ;;  %v88_v2 = vld [vmem:[%s5247_s0 + $0x8] sm:$0xff]  ;;  %vm390_vm11 = vcmask 1040384   ;;  %vm407_vm14 = vcmask 1046528  }
   0x7   :  { %v896_v23 = vrot.slane %v3508_v15, %v3610_v17  ;;  %v903_v24 = vrot.slane %v3510_v16, %v3610_v17  ;;  %v914_v25 = vrot.slane %v3511_v18, %v3610_v17  ;;  %3174 = vmatprep.mubr.msk.f32.mxu0 %vm100_vm0, %v3621_v21  ;;  %v921_v28 = vrot.slane %v3513_v20, %v3610_v17 }
   0x8   :  { %v3286_v29 = vpack.c.bf16 %v2773_v26, %v2772_v22 }
   0x9   :  { %3277 = vmatpush3.bf16.msra.mxu1 %v3274_v11  ;;  %v904_v30 = vcombine.high %v896_v23, %v896_v23  ;;  %v905_v31 = vcombine.high %v903_v24, %v903_v24  ;;  %v922_v32 = vcombine.high %v914_v25, %v914_v25  ;;  %v1038_v33 = vrot.slane %v896_v23, %v3610_v17 }
   0xa   :  { %3279 = vmatprep.subr.bf16.mxu1 %v3278_v19  ;;  %v923_v34 = vcombine.high %v921_v28, %v921_v28  ;;  %v1054_v35 = vrot.slane %v903_v24, %v3610_v17  ;;  %v3640_v36 = vrot.slane %v914_v25, %v3610_v17  ;;  %v3643_v37 = vrot.slane %v921_v28, %v3610_v17 }
   0xb   :  { %v1039_v38 = vcombine.high %v1038_v33, %v1038_v33  ;;  %v1046_v39 = vrot.slane %v904_v30, %v3610_v17  ;;  %v1062_v40 = vrot.slane %v905_v31, %v3610_v17  ;;  %v3648_v41 = vrot.slane %v922_v32, %v3610_v17 }
   0xc   :  { %v1055_v42 = vcombine.high %v1054_v35, %v1054_v35  ;;  %v1071_v43 = vcombine.high %v3640_v36, %v3640_v36  ;;  %v1087_v44 = vcombine.high %v3643_v37, %v3643_v37  ;;  %v3655_v45 = vrot.slane %v923_v34, %v3610_v17 }
   0xd   :  { %3281 = vmatpush3.bf16.msra.mxu1 %v3278_v19  ;;  %v1047_v46 = vcombine.high %v1046_v39, %v1046_v39  ;;  %v1063_v47 = vcombine.high %v1062_v40, %v1062_v40  ;;  %v1079_v48 = vcombine.high %v3648_v41, %v3648_v41  ;;  %v1353_v49 = vsel %vm1352_vm1, %v1038_v33, -inf }
   0xe   :  { %3283 = vmatprep.subr.bf16.mxu1 %v3282_v27  ;;  %v1095_v50 = vcombine.high %v3655_v45, %v3655_v45  ;;  %v1354_v51 = vrot.slane %v1353_v49, 4  ;;  %v1360_v52 = vsel %vm1352_vm1, %v1039_v38, -inf  ;;  %v1367_v53 = vsel %vm1352_vm1, %v1046_v39, -inf }
   0xf   :  { %v1361_v54 = vrot.slane %v1360_v52, 4  ;;  %v1368_v55 = vrot.slane %v1367_v53, 4  ;;  %v1374_v56 = vsel %vm1352_vm1, %v1047_v46, -inf  ;;  %v1381_v57 = vsel %vm1352_vm1, %v1054_v35, -inf }
  0x10   :  { %v1355_v58 = vmax.f32 %v1353_v49, %v1354_v51  ;;  %v1375_v59 = vrot.slane %v1374_v56, 4  ;;  %v1382_v60 = vrot.slane %v1381_v57, 4  ;;  %v1388_v61 = vsel %vm1352_vm1, %v1055_v42, -inf }
  0x11   :  { %3285 = vmatpush3.bf16.msra.mxu1 %v3282_v27  ;;  %v1362_v62 = vmax.f32 %v1360_v52, %v1361_v54  ;;  %v1369_v63 = vmax.f32 %v1367_v53, %v1368_v55  ;;  %v1389_v0 = vrot.slane %v1388_v61, 4  ;;  %v1395_v1 = vsel %vm1352_vm1, %v1062_v40, -inf }
  0x12   :  { %v1356_v3 = vrot.slane %v1355_v58, 2  ;;  %v1376_v4 = vmax.f32 %v1374_v56, %v1375_v59  ;;  %v1383_v5 = vmax.f32 %v1381_v57, %v1382_v60  ;;  %v1396_v6 = vrot.slane %v1395_v1, 4  ;;  %3287 = vmatprep.subr.bf16.mxu1 %v3286_v29 }
  0x13   :  { %v1363_v7 = vrot.slane %v1362_v62, 2  ;;  %v1370_v8 = vrot.slane %v1369_v63, 2  ;;  %v1390_v9 = vmax.f32 %v1388_v61, %v1389_v0  ;;  %v1402_v11 = vsel %vm1352_vm1, %v1063_v47, -inf }
  0x14   :  { %v1357_v12 = vmax.f32 %v1355_v58, %v1356_v3  ;;  %v1377_v13 = vrot.slane %v1376_v4, 2  ;;  %v1384_v14 = vrot.slane %v1383_v5, 2  ;;  %v1397_v15 = vmax.f32 %v1395_v1, %v1396_v6  ;;  %3131 = vmatmul.mubr.msk.f32.vlgmr.msra.gmra.mrb[0].mxu1 %vm100_vm0, %v88_v2 }
  0x15   :  { %v1364_v16 = vmax.f32 %v1362_v62, %v1363_v7  ;;  %v1371_v18 = vmax.f32 %v1369_v63, %v1370_v8  ;;  %v1391_v19 = vrot.slane %v1390_v9, 2  ;;  %v1403_v20 = vrot.slane %v1402_v11, 4  ;;  %3289 = vmatpush3.bf16.msra.mxu1 %v3286_v29 }
  0x16   :  { %v1358_v22 = vrot.slane %v1357_v12, 1  ;;  %v1378_v23 = vmax.f32 %v1376_v4, %v1377_v13  ;;  %v1385_v24 = vmax.f32 %v1383_v5, %v1384_v14  ;;  %v1398_v25 = vrot.slane %v1397_v15, 2 }
  0x17   :  { %v1365_v26 = vrot.slane %v1364_v16, 1  ;;  %v1372_v27 = vrot.slane %v1371_v18, 1  ;;  %v1392_v28 = vmax.f32 %v1390_v9, %v1391_v19  ;;  %v1404_v30 = vmax.f32 %v1402_v11, %v1403_v20 }
  0x18   :  { %v3673_v31 = vmax.f32 %v1357_v12, %v1358_v22  ;;  %v1379_v32 = vrot.slane %v1378_v23, 1  ;;  %v1386_v33 = vrot.slane %v1385_v24, 1  ;;  %v1399_v34 = vmax.f32 %v1397_v15, %v1398_v25 }
  0x19   :  { %v3675_v35 = vmax.f32 %v1364_v16, %v1365_v26  ;;  %v3677_v38 = vmax.f32 %v1371_v18, %v1372_v27  ;;  %v1393_v39 = vrot.slane %v1392_v28, 1  ;;  %v1405_v40 = vrot.slane %v1404_v30, 2  ;;  %v3514_v27 = vld [vmem:[%s5246_s2 + $0x20] ss:$8 sps:$4 sm:$0xff]  }
  0x1a   :  { %v3679_v29 = vmax.f32 %v1378_v23, %v1379_v32  ;;  %v3681_v42 = vmax.f32 %v1385_v24, %v1386_v33  ;;  %v1400_v46 = vrot.slane %v1399_v34, 1  ;;  %v1409_v47 = vsel %vm1352_vm1, %v3640_v36, -inf }
  0x1b   :  { %v3685_v49 = vmax.f32 %v1392_v28, %v1393_v39  ;;  %v1406_v51 = vmax.f32 %v1404_v30, %v1405_v40  ;;  %v1410_v52 = vrot.slane %v1409_v47, 4  ;;  %v1416_v53 = vsel %vm1352_vm1, %v1071_v43, -inf }
  0x1c   :  { %v3691_v54 = vmax.f32 %v1399_v34, %v1400_v46  ;;  %v1417_v55 = vrot.slane %v1416_v53, 4  ;;  %v1423_v56 = vsel %vm1352_vm1, %v3648_v41, -inf  ;;  %v1430_v57 = vsel %vm1352_vm1, %v1079_v48, -inf }
  0x1d   :  { %v1407_v58 = vrot.slane %v1406_v51, 1  ;;  %v1411_v59 = vmax.f32 %v1409_v47, %v1410_v52  ;;  %v1424_v60 = vrot.slane %v1423_v56, 4  ;;  %v1431_v61 = vrot.slane %v1430_v57, 4  ;;  %v3516_v47 = vld [vmem:[%s5246_s2 + $0x24] ss:$8 sps:$4 sm:$0xff]  }
  0x1e   :  { %v1418_v36 = vmax.f32 %v1416_v53, %v1417_v55  ;;  %v1437_v43 = vsel %vm1352_vm1, %v3643_v37, -inf  ;;  %v1444_v62 = vsel %vm1352_vm1, %v1087_v44, -inf  ;;  %v1451_v41 = vsel %vm1352_vm1, %v3655_v45, -inf  ;;  %v89_v45 = vld [vmem:[%s5247_s0 + $0x10] sm:$0xff] }
  0x1f   :  { %v3707_v48 = vmax.f32 %v1406_v51, %v1407_v58  ;;  %v1412_v63 = vrot.slane %v1411_v59, 2  ;;  %v1425_v0 = vmax.f32 %v1423_v56, %v1424_v60  ;;  %v1432_v1 = vmax.f32 %v1430_v57, %v1431_v61  ;;  %3133 = vmatprep.mubr.msk.f32.mxu1 %vm100_vm0, %v89_v45  ;;  %v3517_v56 = vld [vmem:[%s5246_s2 + $0x30] ss:$8 sps:$4 sm:$0xff]  }
  0x20   :  { %v1419_v2 = vrot.slane %v1418_v36, 2  ;;  %v1438_v3 = vrot.slane %v1437_v43, 4  ;;  %v1445_v4 = vrot.slane %v1444_v62, 4  ;;  %v1452_v5 = vrot.slane %v1451_v41, 4 }
  0x21   :  { %v1413_v6 = vmax.f32 %v1411_v59, %v1412_v63  ;;  %v1426_v7 = vrot.slane %v1425_v0, 2  ;;  %v1433_v37 = vrot.slane %v1432_v1, 2  ;;  %v1458_v44 = vsel %vm1352_vm1, %v1095_v50, -inf  ;;  %v90_v50 = vld [vmem:[%s5247_s0 + $0x18] sm:$0xff] }
  0x22   :  { %v1420_v8 = vmax.f32 %v1418_v36, %v1419_v2  ;;  %v1439_v9 = vmax.f32 %v1437_v43, %v1438_v3  ;;  %v1446_v11 = vmax.f32 %v1444_v62, %v1445_v4  ;;  %v1453_v12 = vmax.f32 %v1451_v41, %v1452_v5  ;;  %3134 = vmatmul.mubr.msk.f32.gmra.mrb[2].mxu1 %vm100_vm0, %v90_v50  ;;  %v3519_v62 = vld [vmem:[%s5246_s2 + $0x34] ss:$8 sps:$4 sm:$0xff]  }
  0x23   :  { %v1414_v13 = vrot.slane %v1413_v6, 1  ;;  %v1427_v14 = vmax.f32 %v1425_v0, %v1426_v7  ;;  %v1434_v15 = vmax.f32 %v1432_v1, %v1433_v37  ;;  %v1459_v16 = vrot.slane %v1458_v44, 4  ;;  %3152 = vmatprep.mubr.msk.f32.mxu1 %vm100_vm0, %v3621_v21 }
  0x24   :  { %v1421_v18 = vrot.slane %v1420_v8, 1  ;;  %v1440_v19 = vrot.slane %v1439_v9, 2  ;;  %v1447_v20 = vrot.slane %v1446_v11, 2  ;;  %v1454_v22 = vrot.slane %v1453_v12, 2 }
  0x25   :  { %v3719_v23 = vmax.f32 %v1413_v6, %v1414_v13  ;;  %v1428_v24 = vrot.slane %v1427_v14, 1  ;;  %v1435_v25 = vrot.slane %v1434_v15, 1  ;;  %v1460_v26 = vmax.f32 %v1458_v44, %v1459_v16 }
  0x26   :  { %v3725_v28 = vmax.f32 %v1420_v8, %v1421_v18  ;;  %v1441_v30 = vmax.f32 %v1439_v9, %v1440_v19  ;;  %v1448_v32 = vmax.f32 %v1446_v11, %v1447_v20  ;;  %v1455_v33 = vmax.f32 %v1453_v12, %v1454_v22 }
  0x27   :  { %v3728_v34 = vmax.f32 %v1427_v14, %v1428_v24  ;;  %v3730_v39 = vmax.f32 %v1434_v15, %v1435_v25  ;;  %v1461_v40 = vrot.slane %v1460_v26, 2  ;;  %v1866_v46 = vsel %vm1865_vm2, %v3677_v38, %v3673_v31 }
  0x28   :  { %v1442_v51 = vrot.slane %v1441_v30, 1  ;;  %v1449_v52 = vrot.slane %v1448_v32, 1  ;;  %v1456_v53 = vrot.slane %v1455_v33, 1  ;;  %v1868_v55 = vsel %vm1867_vm3, %v3681_v42, %v1866_v46 }
  0x29   :  { %v1462_v57 = vmax.f32 %v1460_v26, %v1461_v40  ;;  %v1870_v58 = vsel %vm1869_vm4, %v3691_v54, %v1868_v55  ;;  %v1879_v59 = vsel %vm1865_vm2, %v3679_v29, %v3675_v35  ;;  %v932_v21 = vrot.slane %v3514_v27, %v3610_v17 }
  0x2a   :  { %v3751_v60 = vmax.f32 %v1441_v30, %v1442_v51  ;;  %v3753_v61 = vmax.f32 %v1448_v32, %v1449_v52  ;;  %v3755_v36 = vmax.f32 %v1455_v33, %v1456_v53  ;;  %v1872_v43 = vsel %vm1871_vm5, %v3719_v23, %v1870_v58 }
  0x2b   :  { %v1463_v41 = vrot.slane %v1462_v57, 1  ;;  %v1874_v63 = vsel %vm1873_vm6, %v3728_v34, %v1872_v43  ;;  %v1880_v0 = vsel %vm1867_vm3, %v3685_v49, %v1879_v59  ;;  %v939_v1 = vrot.slane %v3516_v47, %v3610_v17 }
  0x2c   :  { %5307 = vst [vmem:[#allocation3_spill] sm:$0xff] %v3751_v60  ;;  %5308 = vst [vmem:[#allocation4_spill] sm:$0xff] %v3755_v36  ;;  %v1876_v2 = vsel %vm1875_vm7, %v3751_v60, %v1874_v63  ;;  %v1881_v3 = vsel %vm1869_vm4, %v3707_v48, %v1880_v0  ;;  %v940_v4 = vcombine.high %v932_v21, %v932_v21 }
  0x2d   :  { %v950_v5 = vrot.slane %v3517_v56, %v3610_v17  ;;  %v3772_v6 = vmax.f32 %v1462_v57, %v1463_v41  ;;  %v1878_v7 = vsel %vm1877_vm8, %v3755_v36, %v1876_v2  ;;  %v1882_v37 = vsel %vm1871_vm5, %v3725_v28, %v1881_v3 }
  0x2e   :  { %v941_v44 = vcombine.high %v939_v1, %v939_v1  ;;  %v1883_v8 = vsel %vm1873_vm6, %v3730_v39, %v1882_v37  ;;  %v957_v9 = vrot.slane %v3519_v62, %v3610_v17  ;;  %v1102_v12 = vrot.slane %v932_v21, %v3610_v17 }
  0x2f   :  { %v958_v11 = vcombine.high %v950_v5, %v950_v5  ;;  %v1884_v13 = vsel %vm1875_vm7, %v3753_v61, %v1883_v8  ;;  %v1110_v14 = vrot.slane %v940_v4, %v3610_v17  ;;  %v1118_v15 = vrot.slane %v939_v1, %v3610_v17 }
  0x30   :  { %v1126_v16 = vrot.slane %v941_v44, %v3610_v17  ;;  %v1885_v18 = vsel %vm1877_vm8, %v3772_v6, %v1884_v13  ;;  %v959_v19 = vcombine.high %v957_v9, %v957_v9  ;;  %v1103_v20 = vcombine.high %v1102_v12, %v1102_v12 }
  0x31   :  { %v3790_v22 = vrot.slane %v950_v5, %v3610_v17  ;;  %v3488_v45 = vpack.i.bf16 %v1885_v18, %v1878_v7  ;;  %v1111_v50 = vcombine.high %v1110_v14, %v1110_v14  ;;  %v1119_v24 = vcombine.high %v1118_v15, %v1118_v15 }
  0x32   :  { %v1127_v25 = vcombine.high %v1126_v16, %v1126_v16  ;;  %v3795_v27 = vrot.slane %v958_v11, %v3610_v17  ;;  %v3798_v30 = vrot.slane %v957_v9, %v3610_v17  ;;  %v3801_v32 = vrot.slane %v959_v19, %v3610_v17 }
  0x33   :  { %v1135_v26 = vcombine.high %v3790_v22, %v3790_v22  ;;  %3489 = vrot.lane.b32.xlu0 %v3488_v45, %s3536_s22  ;;  %v1465_v33 = vsel %vm1352_vm1, %v1102_v12, -inf  ;;  %v1472_v40 = vsel %vm1352_vm1, %v1103_v20, -inf  ;;  %v1479_v46 = vsel %vm1352_vm1, %v1110_v14, -inf }
  0x34   :  { %v1486_v47 = vsel %vm1352_vm1, %v1111_v50, -inf  ;;  %v1143_v51 = vcombine.high %v3795_v27, %v3795_v27  ;;  %v1151_v52 = vcombine.high %v3798_v30, %v3798_v30  ;;  %v1159_v53 = vcombine.high %v3801_v32, %v3801_v32 }
  0x35   :  { %v1466_v55 = vrot.slane %v1465_v33, 4  ;;  %v1473_v56 = vrot.slane %v1472_v40, 4  ;;  %v1480_v57 = vrot.slane %v1479_v46, 4  ;;  %v1487_v58 = vrot.slane %v1486_v47, 4 }
  0x36   :  { %v1493_v59 = vsel %vm1352_vm1, %v1118_v15, -inf  ;;  %v1500_v62 = vsel %vm1352_vm1, %v1119_v24, -inf  ;;  %v1507_v41 = vsel %vm1352_vm1, %v1126_v16, -inf  ;;  %v1514_v7 = vsel %vm1352_vm1, %v1127_v25, -inf }
  0x37   :  { %v1467_v21 = vmax.f32 %v1465_v33, %v1466_v55  ;;  %v1494_v43 = vrot.slane %v1493_v59, 4  ;;  %v1474_v63 = vmax.f32 %v1472_v40, %v1473_v56  ;;  %v1481_v0 = vmax.f32 %v1479_v46, %v1480_v57 }
  0x38   :  { %v1488_v1 = vmax.f32 %v1486_v47, %v1487_v58  ;;  %v1501_v2 = vrot.slane %v1500_v62, 4  ;;  %v1508_v5 = vrot.slane %v1507_v41, 4  ;;  %v1515_v14 = vrot.slane %v1514_v7, 4 }
  0x39   :  { %v1468_v3 = vrot.slane %v1467_v21, 2  ;;  %v1495_v4 = vmax.f32 %v1493_v59, %v1494_v43  ;;  %v1475_v37 = vrot.slane %v1474_v63, 2  ;;  %v1482_v44 = vrot.slane %v1481_v0, 2 }
  0x3a   :  { %v1489_v8 = vrot.slane %v1488_v1, 2  ;;  %v1502_v9 = vmax.f32 %v1500_v62, %v1501_v2  ;;  %v1509_v13 = vmax.f32 %v1507_v41, %v1508_v5  ;;  %v1516_v24 = vmax.f32 %v1514_v7, %v1515_v14 }
  0x3b   :  { %v1469_v11 = vmax.f32 %v1467_v21, %v1468_v3  ;;  %v1496_v12 = vrot.slane %v1495_v4, 2  ;;  %v1476_v15 = vmax.f32 %v1474_v63, %v1475_v37  ;;  %v1483_v18 = vmax.f32 %v1481_v0, %v1482_v44 }
  0x3c   :  { %v1490_v16 = vmax.f32 %v1488_v1, %v1489_v8  ;;  %v1503_v19 = vrot.slane %v1502_v9, 2  ;;  %v1510_v50 = vrot.slane %v1509_v13, 2  ;;  %v1517_v57 = vrot.slane %v1516_v24, 2 }
  0x3d   :  { %v1470_v20 = vrot.slane %v1469_v11, 1  ;;  %v1497_v45 = vmax.f32 %v1495_v4, %v1496_v12  ;;  %v1477_v33 = vrot.slane %v1476_v15, 1  ;;  %v1484_v40 = vrot.slane %v1483_v18, 1 }
  0x3e   :  { %v1491_v46 = vrot.slane %v1490_v16, 1  ;;  %v1504_v25 = vmax.f32 %v1502_v9, %v1503_v19  ;;  %v1511_v56 = vmax.f32 %v1509_v13, %v1510_v50  ;;  %v1518_v63 = vmax.f32 %v1516_v24, %v1517_v57 }
  0x3f   :  { %v3818_v47 = vmax.f32 %v1469_v11, %v1470_v20  ;;  %v1498_v55 = vrot.slane %v1497_v45, 1  ;;  %v3820_v58 = vmax.f32 %v1476_v15, %v1477_v33  ;;  %v3822_v59 = vmax.f32 %v1483_v18, %v1484_v40 }
  0x40   :  { %v3824_v21 = vmax.f32 %v1490_v16, %v1491_v46  ;;  %v1505_v43 = vrot.slane %v1504_v25, 1  ;;  %v1512_v41 = vrot.slane %v1511_v56, 1  ;;  %v1521_v0 = vsel %vm1352_vm1, %v3790_v22, -inf }
  0x41   :  { %v3826_v62 = vmax.f32 %v1497_v45, %v1498_v55  ;;  %v1522_v2 = vrot.slane %v1521_v0, 4  ;;  %v1528_v3 = vsel %vm1352_vm1, %v1135_v26, -inf  ;;  %v1535_v4 = vsel %vm1352_vm1, %v3795_v27, -inf }
  0x42   :  { %v3830_v1 = vmax.f32 %v1504_v25, %v1505_v43  ;;  %v3838_v5 = vmax.f32 %v1511_v56, %v1512_v41  ;;  %v1519_v7 = vrot.slane %v1518_v63, 1  ;;  %v1529_v37 = vrot.slane %v1528_v3, 4 }
  0x43   :  { %v1536_v44 = vrot.slane %v1535_v4, 4  ;;  %v1523_v8 = vmax.f32 %v1521_v0, %v1522_v2  ;;  %v1542_v9 = vsel %vm1352_vm1, %v1143_v51, -inf  ;;  %v1549_v11 = vsel %vm1352_vm1, %v3798_v30, -inf }
  0x44   :  { %v1556_v12 = vsel %vm1352_vm1, %v1151_v52, -inf  ;;  %v3844_v13 = vmax.f32 %v1518_v63, %v1519_v7  ;;  %v1530_v22 = vmax.f32 %v1528_v3, %v1529_v37  ;;  %v1543_v14 = vrot.slane %v1542_v9, 4 }
  0x45   :  { %v1537_v26 = vmax.f32 %v1535_v4, %v1536_v44  ;;  %v1524_v15 = vrot.slane %v1523_v8, 2  ;;  %v1550_v27 = vrot.slane %v1549_v11, 4  ;;  %v1557_v18 = vrot.slane %v1556_v12, 4 }
  0x46   :  { %v1563_v16 = vsel %vm1352_vm1, %v3801_v32, -inf  ;;  %v1531_v19 = vrot.slane %v1530_v22, 2  ;;  %v1544_v45 = vmax.f32 %v1542_v9, %v1543_v14  ;;  %v1570_v52 = vsel %vm1352_vm1, %v1159_v53, -inf  ;;  %v2774_v9 = vld [vmem:[%s5245_s3 + $0x50] sm:$0xff]  ;;  %v2775_v14 = vld [vmem:[%s5245_s3 + $0x58] sm:$0xff] }
  0x47   :  { %v1538_v20 = vrot.slane %v1537_v26, 2  ;;  %v1564_v51 = vrot.slane %v1563_v16, 4  ;;  %v1525_v50 = vmax.f32 %v1523_v8, %v1524_v15  ;;  %v1551_v24 = vmax.f32 %v1549_v11, %v1550_v27  ;;  %v3520_v15 = vld [vmem:[%s5246_s2 + $0x40] ss:$8 sps:$4 sm:$0xff]  }
  0x48   :  { %v1558_v30 = vmax.f32 %v1556_v12, %v1557_v18  ;;  %v1532_v33 = vmax.f32 %v1530_v22, %v1531_v19  ;;  %v1545_v46 = vrot.slane %v1544_v45, 2  ;;  %v1571_v43 = vrot.slane %v1570_v52, 4 }
  0x49   :  { %v1539_v40 = vmax.f32 %v1537_v26, %v1538_v20  ;;  %v1565_v25 = vmax.f32 %v1563_v16, %v1564_v51  ;;  %v1526_v55 = vrot.slane %v1525_v50, 1  ;;  %v1552_v56 = vrot.slane %v1551_v24, 2  ;;  %v3522_v20 = vld [vmem:[%s5246_s2 + $0x44] ss:$8 sps:$4 sm:$0xff]  }
  0x4a   :  { %v1559_v57 = vrot.slane %v1558_v30, 2  ;;  %v1533_v41 = vrot.slane %v1532_v33, 1  ;;  %v1546_v0 = vmax.f32 %v1544_v45, %v1545_v46  ;;  %v1572_v37 = vmax.f32 %v1570_v52, %v1571_v43  ;;  %v3523_v45 = vld [vmem:[%s5246_s2 + $0x50] ss:$8 sps:$4 sm:$0xff]  }
  0x4b   :  { %v1540_v63 = vrot.slane %v1539_v40, 1  ;;  %v1566_v2 = vrot.slane %v1565_v25, 2  ;;  %v3852_v3 = vmax.f32 %v1525_v50, %v1526_v55  ;;  %v1553_v4 = vmax.f32 %v1551_v24, %v1552_v56 }
  0x4c   :  { %v1560_v7 = vmax.f32 %v1558_v30, %v1559_v57  ;;  %v3854_v32 = vmax.f32 %v1532_v33, %v1533_v41  ;;  %v1547_v44 = vrot.slane %v1546_v0, 1  ;;  %v1573_v22 = vrot.slane %v1572_v37, 2 }
  0x4d   :  { %5309 = vst [vmem:[#allocation5_spill] sm:$0xff] %v3852_v3  ;;  %v3856_v53 = vmax.f32 %v1539_v40, %v1540_v63  ;;  %v1567_v8 = vmax.f32 %v1565_v25, %v1566_v2  ;;  %v1554_v11 = vrot.slane %v1553_v4, 1  ;;  %v1886_v26 = vsel %vm1865_vm2, %v3822_v59, %v3818_v47  ;;  %v3525_v25 = vld [vmem:[%s5246_s2 + $0x54] ss:$8 sps:$4 sm:$0xff]  }
  0x4e   :  { %v1561_v12 = vrot.slane %v1560_v7, 1  ;;  %v3870_v27 = vmax.f32 %v1546_v0, %v1547_v44  ;;  %v1887_v16 = vsel %vm1867_vm3, %v3826_v62, %v1886_v26  ;;  %v1893_v19 = vsel %vm1865_vm2, %v3824_v21, %v3820_v58 }
  0x4f   :  { %5310 = vst [vmem:[#allocation6_spill] sm:$0xff] %v3856_v53  ;;  %v1568_v18 = vrot.slane %v1567_v8, 1  ;;  %v3883_v51 = vmax.f32 %v1553_v4, %v1554_v11  ;;  %v1574_v24 = vmax.f32 %v1572_v37, %v1573_v22  ;;  %v1888_v30 = vsel %vm1869_vm4, %v3838_v5, %v1887_v16 }
  0x50   :  { %v3885_v50 = vmax.f32 %v1560_v7, %v1561_v12  ;;  %v1889_v33 = vsel %vm1871_vm5, %v3852_v3, %v1888_v30  ;;  %v1894_v40 = vsel %vm1867_vm3, %v3830_v1, %v1893_v19  ;;  %v3290_v46 = vpack.c.bf16 %v2775_v14, %v2774_v9 }
  0x51   :  { %5311 = vst [vmem:[#allocation7_spill] sm:$0xff] %v3883_v51  ;;  %v3889_v52 = vmax.f32 %v1567_v8, %v1568_v18  ;;  %v1575_v55 = vrot.slane %v1574_v24, 1  ;;  %v1890_v56 = vsel %vm1873_vm6, %v3856_v53, %v1889_v33  ;;  %v1895_v57 = vsel %vm1869_vm4, %v3844_v13, %v1894_v40 }
  0x52   :  { %5312 = vst [vmem:[#allocation8_spill] sm:$0xff] %v3885_v50  ;;  %v968_v43 = vrot.slane %v3520_v15, %v3610_v17  ;;  %v1891_v41 = vsel %vm1875_vm7, %v3883_v51, %v1890_v56  ;;  %v1896_v63 = vsel %vm1871_vm5, %v3854_v32, %v1895_v57  ;;  %3291 = vmatprep.subr.bf16.mxu1 %v3290_v46 }
  0x53   :  { %5313 = vst [vmem:[#allocation9_spill] sm:$0xff] %v3889_v52  ;;  %v975_v0 = vrot.slane %v3522_v20, %v3610_v17  ;;  %v986_v2 = vrot.slane %v3523_v45, %v3610_v17  ;;  %v3909_v4 = vmax.f32 %v1574_v24, %v1575_v55  ;;  %v1892_v7 = vsel %vm1877_vm8, %v3889_v52, %v1891_v41 }
  0x54   :  { %v1897_v37 = vsel %vm1873_vm6, %v3870_v27, %v1896_v63  ;;  %3293 = vmatpush3.bf16.msra.mxu1 %v3290_v46  ;;  %v976_v44 = vcombine.high %v968_v43, %v968_v43  ;;  %v993_v11 = vrot.slane %v3525_v25, %v3610_v17  ;;  %v1166_v26 = vrot.slane %v968_v43, %v3610_v17 }
  0x55   :  { %5314 = vst [vmem:[#allocation10_spill] sm:$0xff] %v3909_v4  ;;  %v1898_v8 = vsel %vm1875_vm7, %v3885_v50, %v1897_v37  ;;  %v977_v9 = vcombine.high %v975_v0, %v975_v0  ;;  %v994_v12 = vcombine.high %v986_v2, %v986_v2  ;;  %v1182_v15 = vrot.slane %v975_v0, %v3610_v17 }
  0x56   :  { %v1899_v22 = vsel %vm1877_vm8, %v3909_v4, %v1898_v8  ;;  %v1174_v14 = vrot.slane %v976_v44, %v3610_v17  ;;  %v995_v16 = vcombine.high %v993_v11, %v993_v11  ;;  %v3925_v20 = vrot.slane %v986_v2, %v3610_v17 }
  0x57   :  { %v3493_v18 = vpack.i.bf16 %v1899_v22, %v1892_v7  ;;  %v1190_v19 = vrot.slane %v977_v9, %v3610_v17  ;;  %v1167_v45 = vcombine.high %v1166_v26, %v1166_v26  ;;  %v1183_v30 = vcombine.high %v1182_v15, %v1182_v15 }
  0x58   :  { %v1175_v24 = vcombine.high %v1174_v14, %v1174_v14  ;;  %v3928_v33 = vrot.slane %v994_v12, %v3610_v17  ;;  %v1199_v46 = vcombine.high %v3925_v20, %v3925_v20  ;;  %v3934_v25 = vrot.slane %v993_v11, %v3610_v17 }
  0x59   :  { %3494 = vrot.lane.b32.xlu0 %v3493_v18, %s3536_s22  ;;  %v1191_v40 = vcombine.high %v1190_v19, %v1190_v19  ;;  %v3937_v55 = vrot.slane %v995_v16, %v3610_v17  ;;  %v1577_v57 = vsel %vm1352_vm1, %v1166_v26, -inf  ;;  %v1584_v43 = vsel %vm1352_vm1, %v1167_v45, -inf }
  0x5a   :  { %v1207_v56 = vcombine.high %v3928_v33, %v3928_v33  ;;  %v1591_v41 = vsel %vm1352_vm1, %v1174_v14, -inf  ;;  %v1578_v2 = vrot.slane %v1577_v57, 4  ;;  %v1585_v7 = vrot.slane %v1584_v43, 4 }
  0x5b   :  { %v1592_v37 = vrot.slane %v1591_v41, 4  ;;  %v1598_v44 = vsel %vm1352_vm1, %v1175_v24, -inf  ;;  %v1605_v8 = vsel %vm1352_vm1, %v1182_v15, -inf  ;;  %v1612_v9 = vsel %vm1352_vm1, %v1183_v30, -inf }
  0x5c   :  { %v1579_v11 = vmax.f32 %v1577_v57, %v1578_v2  ;;  %v1586_v12 = vmax.f32 %v1584_v43, %v1585_v7  ;;  %v1599_v22 = vrot.slane %v1598_v44, 4  ;;  %v1606_v26 = vrot.slane %v1605_v8, 4 }
  0x5d   :  { %v1593_v14 = vmax.f32 %v1591_v41, %v1592_v37  ;;  %v1613_v18 = vrot.slane %v1612_v9, 4  ;;  %v1619_v16 = vsel %vm1352_vm1, %v1190_v19, -inf  ;;  %v1626_v45 = vsel %vm1352_vm1, %v1191_v40, -inf }
  0x5e   :  { %v1580_v0 = vrot.slane %v1579_v11, 2  ;;  %v1587_v63 = vrot.slane %v1586_v12, 2  ;;  %v1600_v10 = vmax.f32 %v1598_v44, %v1599_v22  ;;  %v1607_v52 = vmax.f32 %v1605_v8, %v1606_v26 }
  0x5f   :  { %v1594_v36 = vrot.slane %v1593_v14, 2  ;;  %v1614_v24 = vmax.f32 %v1612_v9, %v1613_v18  ;;  %v1620_v51 = vrot.slane %v1619_v16, 4  ;;  %v1627_v15 = vrot.slane %v1626_v45, 4 }
  0x60   :  { %v1581_v4 = vmax.f32 %v1579_v11, %v1580_v0  ;;  %v1588_v30 = vmax.f32 %v1586_v12, %v1587_v63  ;;  %v1601_v57 = vrot.slane %v1600_v10, 2  ;;  %v1608_v43 = vrot.slane %v1607_v52, 2 }
  0x61   :  { %v1595_v2 = vmax.f32 %v1593_v14, %v1594_v36  ;;  %v1615_v7 = vrot.slane %v1614_v24, 2  ;;  %v1621_v41 = vmax.f32 %v1619_v16, %v1620_v51  ;;  %v1628_v37 = vmax.f32 %v1626_v45, %v1627_v15 }
  0x62   :  { %v1582_v60 = vrot.slane %v1581_v4, 1  ;;  %v1589_v19 = vrot.slane %v1588_v30, 1  ;;  %v1602_v53 = vmax.f32 %v1600_v10, %v1601_v57  ;;  %v1609_v40 = vmax.f32 %v1607_v52, %v1608_v43 }
  0x63   :  { %v1596_v50 = vrot.slane %v1595_v2, 1  ;;  %v1616_v3 = vmax.f32 %v1614_v24, %v1615_v7  ;;  %v1622_v44 = vrot.slane %v1621_v41, 2  ;;  %v1629_v8 = vrot.slane %v1628_v37, 2 }
  0x64   :  { %v3953_v22 = vmax.f32 %v1581_v4, %v1582_v60  ;;  %v3955_v9 = vmax.f32 %v1588_v30, %v1589_v19  ;;  %v1603_v0 = vrot.slane %v1602_v53, 1  ;;  %v1610_v63 = vrot.slane %v1609_v40, 1 }
  0x65   :  { %v3957_v11 = vmax.f32 %v1595_v2, %v1596_v50  ;;  %v1617_v36 = vrot.slane %v1616_v3, 1  ;;  %v1623_v12 = vmax.f32 %v1621_v41, %v1622_v44  ;;  %v1630_v51 = vmax.f32 %v1628_v37, %v1629_v8 }
  0x66   :  { %5315 = vst [vmem:[#allocation11_spill] sm:$0xff] %v3953_v22  ;;  %5316 = vst [vmem:[#allocation12_spill] sm:$0xff] %v3955_v9  ;;  %v3959_v26 = vmax.f32 %v1602_v53, %v1603_v0  ;;  %v3961_v14 = vmax.f32 %v1609_v40, %v1610_v63  ;;  %v1633_v10 = vsel %vm1352_vm1, %v3925_v20, -inf  ;;  %v1640_v52 = vsel %vm1352_vm1, %v1199_v46, -inf }
  0x67   :  { %5317 = vst [vmem:[#allocation13_spill] sm:$0xff] %v3957_v11  ;;  %v3966_v60 = vmax.f32 %v1616_v3, %v1617_v36  ;;  %v1624_v4 = vrot.slane %v1623_v12, 1  ;;  %v1631_v18 = vrot.slane %v1630_v51, 1  ;;  %v1634_v16 = vrot.slane %v1633_v10, 4 }
  0x68   :  { %5318 = vst [vmem:[#allocation14_spill] sm:$0xff] %v3959_v26  ;;  %5319 = vst [vmem:[#allocation15_spill] sm:$0xff] %v3961_v14  ;;  %v1641_v45 = vrot.slane %v1640_v52, 4  ;;  %v1647_v50 = vsel %vm1352_vm1, %v3928_v33, -inf  ;;  %v1654_v24 = vsel %vm1352_vm1, %v1207_v56, -inf  ;;  %v1661_v53 = vsel %vm1352_vm1, %v3934_v25, -inf }
  0x69   :  { %5320 = vst [vmem:[#allocation16_spill] sm:$0xff] %v3966_v60  ;;  %v3973_v15 = vmax.f32 %v1623_v12, %v1624_v4  ;;  %v3975_v30 = vmax.f32 %v1630_v51, %v1631_v18  ;;  %v1635_v20 = vmax.f32 %v1633_v10, %v1634_v16  ;;  %v1648_v46 = vrot.slane %v1647_v50, 4 }
  0x6a   :  { %v1642_v3 = vmax.f32 %v1640_v52, %v1641_v45  ;;  %v1655_v57 = vrot.slane %v1654_v24, 4  ;;  %v1662_v43 = vrot.slane %v1661_v53, 4  ;;  %v5323_v2 = vcombine.high %v3934_v25, %v3934_v25 }
  0x6b   :  { %5321 = vst [vmem:[#allocation17_spill] sm:$0xff] %v3973_v15  ;;  %5322 = vst [vmem:[#allocation18_spill] sm:$0xff] %v3975_v30  ;;  %v1636_v33 = vrot.slane %v1635_v20, 2  ;;  %v1649_v41 = vmax.f32 %v1647_v50, %v1648_v46  ;;  %v1675_v37 = vsel %vm1352_vm1, %v3937_v55, -inf  ;;  %v5324_v12 = vcombine.high %v3937_v55, %v3937_v55 }
  0x6c   :  { %v1668_v7 = vsel %vm1352_vm1, %v5323_v2, -inf  ;;  %v1643_v19 = vrot.slane %v1642_v3, 2  ;;  %v1656_v40 = vmax.f32 %v1654_v24, %v1655_v57  ;;  %v1663_v44 = vmax.f32 %v1661_v53, %v1662_v43 }
  0x6d   :  { %v1669_v56 = vrot.slane %v1668_v7, 4  ;;  %v1676_v8 = vrot.slane %v1675_v37, 4  ;;  %v1637_v0 = vmax.f32 %v1635_v20, %v1636_v33  ;;  %v1650_v63 = vrot.slane %v1649_v41, 2 }
  0x6e   :  { %v1682_v25 = vsel %vm1352_vm1, %v5324_v12, -inf  ;;  %v1644_v51 = vmax.f32 %v1642_v3, %v1643_v19  ;;  %v1657_v10 = vrot.slane %v1656_v40, 2  ;;  %v1664_v52 = vrot.slane %v1663_v44, 2 }
  0x6f   :  { %v1670_v36 = vmax.f32 %v1668_v7, %v1669_v56  ;;  %v1677_v4 = vmax.f32 %v1675_v37, %v1676_v8  ;;  %v1638_v18 = vrot.slane %v1637_v0, 1  ;;  %v1651_v16 = vmax.f32 %v1649_v41, %v1650_v63  ;;  %v2777_v8 = vld [vmem:[%s5245_s3 + $0x68] sm:$0xff] }
  0x70   :  { %v1683_v50 = vrot.slane %v1682_v25, 4  ;;  %v1645_v46 = vrot.slane %v1644_v51, 1  ;;  %v1658_v24 = vmax.f32 %v1656_v40, %v1657_v10  ;;  %v1665_v53 = vmax.f32 %v1663_v44, %v1664_v52  ;;  %v2776_v44 = vld [vmem:[%s5245_s3 + $0x60] sm:$0xff]  ;;  %v3529_v10 = vld [vmem:[%s5246_s2 + $0x70] ss:$8 sps:$4 sm:$0xff]  }
  0x71   :  { %v1671_v45 = vrot.slane %v1670_v36, 2  ;;  %v1678_v57 = vrot.slane %v1677_v4, 2  ;;  %v3987_v20 = vmax.f32 %v1637_v0, %v1638_v18  ;;  %v1652_v43 = vrot.slane %v1651_v16, 1  ;;  %v3526_v0 = vld [vmem:[%s5246_s2 + $0x60] ss:$8 sps:$4 sm:$0xff]  }
  0x72   :  { %v1684_v7 = vmax.f32 %v1682_v25, %v1683_v50  ;;  %v3989_v55 = vmax.f32 %v1644_v51, %v1645_v46  ;;  %v1659_v33 = vrot.slane %v1658_v24, 1  ;;  %v1666_v3 = vrot.slane %v1665_v53, 1  ;;  %v3528_v51 = vld [vmem:[%s5246_s2 + $0x64] ss:$8 sps:$4 sm:$0xff]  }
  0x73   :  { %5325 = vst [vmem:[#allocation19_spill] sm:$0xff] %v3987_v20  ;;  %v1672_v2 = vmax.f32 %v1670_v36, %v1671_v45  ;;  %v1679_v56 = vmax.f32 %v1677_v4, %v1678_v57  ;;  %v3991_v19 = vmax.f32 %v1651_v16, %v1652_v43  ;;  %v1900_v40 = vsel %vm1865_vm2, %v3957_v11, %v3953_v22 }
  0x74   :  { %5326 = vst [vmem:[#allocation20_spill] sm:$0xff] %v3989_v55  ;;  %v1685_v41 = vrot.slane %v1684_v7, 2  ;;  %v4005_v63 = vmax.f32 %v1658_v24, %v1659_v33  ;;  %v4007_v36 = vmax.f32 %v1665_v53, %v1666_v3  ;;  %v1901_v25 = vsel %vm1867_vm3, %v3961_v14, %v1900_v40  ;;  %v3531_v53 = vld [vmem:[%s5246_s2 + $0x74] ss:$8 sps:$4 sm:$0xff]  }
  0x75   :  { %5327 = vst [vmem:[#allocation21_spill] sm:$0xff] %v3991_v19  ;;  %v1673_v37 = vrot.slane %v1672_v2, 1  ;;  %v1680_v12 = vrot.slane %v1679_v56, 1  ;;  %v1902_v18 = vsel %vm1869_vm4, %v3973_v15, %v1901_v25  ;;  %v1907_v16 = vsel %vm1865_vm2, %v3959_v26, %v3955_v9 }
  0x76   :  { %5328 = vst [vmem:[#allocation22_spill] sm:$0xff] %v4005_v63  ;;  %5329 = vst [vmem:[#allocation23_spill] sm:$0xff] %v4007_v36  ;;  %v1686_v4 = vmax.f32 %v1684_v7, %v1685_v41  ;;  %v1903_v50 = vsel %vm1871_vm5, %v3987_v20, %v1902_v18  ;;  %v1908_v46 = vsel %vm1867_vm3, %v3966_v60, %v1907_v16 }
  0x77   :  { %v4017_v52 = vmax.f32 %v1672_v2, %v1673_v37  ;;  %v4024_v45 = vmax.f32 %v1679_v56, %v1680_v12  ;;  %v3294_v24 = vpack.c.bf16 %v2777_v8, %v2776_v44  ;;  %v1904_v43 = vsel %vm1873_vm6, %v3991_v19, %v1903_v50 }
  0x78   :  { %v1687_v57 = vrot.slane %v1686_v4, 1  ;;  %v1909_v2 = vsel %vm1869_vm4, %v3975_v30, %v1908_v46  ;;  %v1004_v7 = vrot.slane %v3526_v0, %v3610_v17  ;;  %v1905_v33 = vsel %vm1875_vm7, %v4007_v36, %v1904_v43 }
  0x79   :  { %5330 = vst [vmem:[#allocation24_spill] sm:$0xff] %v4017_v52  ;;  %5331 = vst [vmem:[#allocation25_spill] sm:$0xff] %v4024_v45  ;;  %v1910_v3 = vsel %vm1871_vm5, %v3989_v55, %v1909_v2  ;;  %3295 = vmatprep.subr.bf16.mxu1 %v3294_v24  ;;  %v1011_v56 = vrot.slane %v3528_v51, %v3610_v17  ;;  %v1022_v37 = vrot.slane %v3529_v10, %v3610_v17 }
  0x7a   :  { %v4044_v41 = vmax.f32 %v1686_v4, %v1687_v57  ;;  %v1906_v40 = vsel %vm1877_vm8, %v4024_v45, %v1905_v33  ;;  %v1911_v44 = vsel %vm1873_vm6, %v4005_v63, %v1910_v3  ;;  %3297 = vmatpush3.bf16.msra.mxu1 %v3294_v24  ;;  %v1012_v8 = vcombine.high %v1004_v7, %v1004_v7 }
  0x7b   :  { %v1912_v0 = vsel %vm1875_vm7, %v4017_v52, %v1911_v44  ;;  %v1013_v12 = vcombine.high %v1011_v56, %v1011_v56  ;;  %v1029_v25 = vrot.slane %v3531_v53, %v3610_v17  ;;  %v1030_v18 = vcombine.high %v1022_v37, %v1022_v37 }
  0x7c   :  { %5332 = vst [vmem:[#allocation26_spill] sm:$0xff] %v4044_v41  ;;  %v1913_v51 = vsel %vm1877_vm8, %v4044_v41, %v1912_v0  ;;  %v1230_v10 = vrot.slane %v1004_v7, %v3610_v17  ;;  %v1238_v4 = vrot.slane %v1012_v8, %v3610_v17  ;;  %v1246_v16 = vrot.slane %v1011_v56, %v3610_v17 }
  0x7d   :  { %v3498_v50 = vpack.i.bf16 %v1913_v51, %v1906_v40  ;;  %v1031_v46 = vcombine.high %v1029_v25, %v1029_v25  ;;  %v1254_v24 = vrot.slane %v1013_v12, %v3610_v17  ;;  %v4060_v57 = vrot.slane %v1022_v37, %v3610_v17 }
  0x7e   :  { %v1231_v43 = vcombine.high %v1230_v10, %v1230_v10  ;;  %v1239_v2 = vcombine.high %v1238_v4, %v1238_v4  ;;  %v1247_v53 = vcombine.high %v1246_v16, %v1246_v16  ;;  %v4063_v33 = vrot.slane %v1030_v18, %v3610_v17 }
  0x7f   :  { %3499 = vrot.lane.b32.xlu1 %v3498_v50, %s3536_s22  ;;  %v1255_v7 = vcombine.high %v1254_v24, %v1254_v24  ;;  %v1263_v3 = vcombine.high %v4060_v57, %v4060_v57  ;;  %v4069_v56 = vrot.slane %v1029_v25, %v3610_v17  ;;  %v4072_v40 = vrot.slane %v1031_v46, %v3610_v17 }
  0x80   :  { %v1271_v37 = vcombine.high %v4063_v33, %v4063_v33  ;;  %v1689_v44 = vsel %vm1352_vm1, %v1230_v10, -inf  ;;  %v1696_v8 = vsel %vm1352_vm1, %v1231_v43, -inf  ;;  %v1703_v0 = vsel %vm1352_vm1, %v1238_v4, -inf }
  0x81   :  { %v1690_v25 = vrot.slane %v1689_v44, 4  ;;  %v1697_v51 = vrot.slane %v1696_v8, 4  ;;  %v1704_v50 = vrot.slane %v1703_v0, 4  ;;  %v1710_v17 = vsel %vm1352_vm1, %v1239_v2, -inf }
  0x82   :  { %v1717_v46 = vsel %vm1352_vm1, %v1246_v16, -inf  ;;  %v1724_v45 = vsel %vm1352_vm1, %v1247_v53, -inf  ;;  %v1711_v43 = vrot.slane %v1710_v17, 4  ;;  %v1731_v12 = vsel %vm1352_vm1, %v1254_v24, -inf }
  0x83   :  { %v1691_v10 = vmax.f32 %v1689_v44, %v1690_v25  ;;  %v1698_v36 = vmax.f32 %v1696_v8, %v1697_v51  ;;  %v1718_v19 = vrot.slane %v1717_v46, 4  ;;  %v1705_v4 = vmax.f32 %v1703_v0, %v1704_v50 }
  0x84   :  { %v1725_v20 = vrot.slane %v1724_v45, 4  ;;  %v1738_v15 = vsel %vm1352_vm1, %v1255_v7, -inf  ;;  %v1712_v11 = vmax.f32 %v1710_v17, %v1711_v43  ;;  %v1732_v52 = vrot.slane %v1731_v12, 4 }
  0x85   :  { %v1692_v18 = vrot.slane %v1691_v10, 2  ;;  %v1699_v14 = vrot.slane %v1698_v36, 2  ;;  %v1719_v22 = vmax.f32 %v1717_v46, %v1718_v19  ;;  %v1706_v41 = vrot.slane %v1705_v4, 2 }
  0x86   :  { %v1726_v2 = vmax.f32 %v1724_v45, %v1725_v20  ;;  %v1739_v16 = vrot.slane %v1738_v15, 4  ;;  %v1713_v44 = vrot.slane %v1712_v11, 2  ;;  %v1733_v0 = vmax.f32 %v1731_v12, %v1732_v52 }
  0x87   :  { %v1693_v63 = vmax.f32 %v1691_v10, %v1692_v18  ;;  %v1700_v53 = vmax.f32 %v1698_v36, %v1699_v14  ;;  %v1720_v8 = vrot.slane %v1719_v22, 2  ;;  %v1707_v25 = vmax.f32 %v1705_v4, %v1706_v41 }
  0x88   :  { %v1727_v51 = vrot.slane %v1726_v2, 2  ;;  %v1740_v50 = vmax.f32 %v1738_v15, %v1739_v16  ;;  %v1714_v30 = vmax.f32 %v1712_v11, %v1713_v44  ;;  %v1734_v17 = vrot.slane %v1733_v0, 2 }
  0x89   :  { %v1694_v55 = vrot.slane %v1693_v63, 1  ;;  %v1701_v24 = vrot.slane %v1700_v53, 1  ;;  %v1721_v7 = vmax.f32 %v1719_v22, %v1720_v8  ;;  %v1708_v60 = vrot.slane %v1707_v25, 1 }
  0x8a   :  { %v1728_v26 = vmax.f32 %v1726_v2, %v1727_v51  ;;  %v1741_v19 = vrot.slane %v1740_v50, 2  ;;  %v1715_v45 = vrot.slane %v1714_v30, 1  ;;  %v1735_v18 = vmax.f32 %v1733_v0, %v1734_v17 }
  0x8b   :  { %v4088_v46 = vmax.f32 %v1693_v63, %v1694_v55  ;;  %v4090_v20 = vmax.f32 %v1700_v53, %v1701_v24  ;;  %v1722_v14 = vrot.slane %v1721_v7, 1  ;;  %v4092_v36 = vmax.f32 %v1707_v25, %v1708_v60 }
  0x8c   :  { %v1729_v41 = vrot.slane %v1728_v26, 1  ;;  %v1742_v52 = vmax.f32 %v1740_v50, %v1741_v19  ;;  %v4094_v15 = vmax.f32 %v1714_v30, %v1715_v45  ;;  %v1745_v22 = vsel %vm1352_vm1, %v4060_v57, -inf }
  0x8d   :  { %5333 = vst [vmem:[#allocation27_spill] sm:$0xff] %v4088_v46  ;;  %5334 = vst [vmem:[#allocation28_spill] sm:$0xff] %v4090_v20  ;;  %v4096_v12 = vmax.f32 %v1721_v7, %v1722_v14  ;;  %v1752_v11 = vsel %vm1352_vm1, %v1263_v3, -inf  ;;  %v1736_v63 = vrot.slane %v1735_v18, 1  ;;  %v1746_v43 = vrot.slane %v1745_v22, 4 }
  0x8e   :  { %5335 = vst [vmem:[#allocation29_spill] sm:$0xff] %v4092_v36  ;;  %5336 = vst [vmem:[#allocation30_spill] sm:$0xff] %v4094_v15  ;;  %v4101_v55 = vmax.f32 %v1728_v26, %v1729_v41  ;;  %v1743_v10 = vrot.slane %v1742_v52, 1  ;;  %v1753_v4 = vrot.slane %v1752_v11, 4  ;;  %v1759_v60 = vsel %vm1352_vm1, %v4063_v33, -inf }
  0x8f   :  { %5337 = vst [vmem:[#allocation31_spill] sm:$0xff] %v4096_v12  ;;  %v1766_v2 = vsel %vm1352_vm1, %v1271_v37, -inf  ;;  %v1773_v30 = vsel %vm1352_vm1, %v4069_v56, -inf  ;;  %v4108_v16 = vmax.f32 %v1735_v18, %v1736_v63  ;;  %v1747_v57 = vmax.f32 %v1745_v22, %v1746_v43 }
  0x90   :  { %5338 = vst [vmem:[#allocation32_spill] sm:$0xff] %v4101_v55  ;;  %v4110_v53 = vmax.f32 %v1742_v52, %v1743_v10  ;;  %v1760_v3 = vrot.slane %v1759_v60, 4  ;;  %v1754_v26 = vmax.f32 %v1752_v11, %v1753_v4  ;;  %v1767_v44 = vrot.slane %v1766_v2, 4 }
  0x91   :  { %5339 = vst [vmem:[#allocation33_spill] sm:$0xff] %v4108_v16  ;;  %v1774_v8 = vrot.slane %v1773_v30, 4  ;;  %v5341_v25 = vcombine.high %v4069_v56, %v4069_v56  ;;  %v1748_v33 = vrot.slane %v1747_v57, 2  ;;  %v1787_v50 = vsel %vm1352_vm1, %v4072_v40, -inf }
  0x92   :  { %5340 = vst [vmem:[#allocation34_spill] sm:$0xff] %v4110_v53  ;;  %v1761_v0 = vmax.f32 %v1759_v60, %v1760_v3  ;;  %v1755_v24 = vrot.slane %v1754_v26, 2  ;;  %v1768_v7 = vmax.f32 %v1766_v2, %v1767_v44  ;;  %v1788_v19 = vrot.slane %v1787_v50, 4 }
  0x93   :  { %v1780_v51 = vsel %vm1352_vm1, %v5341_v25, -inf  ;;  %v1775_v17 = vmax.f32 %v1773_v30, %v1774_v8  ;;  %v1749_v45 = vmax.f32 %v1747_v57, %v1748_v33  ;;  %v5342_v18 = vcombine.high %v4072_v40, %v4072_v40 }
  0x94   :  { %v1781_v37 = vrot.slane %v1780_v51, 4  ;;  %v1762_v14 = vrot.slane %v1761_v0, 2  ;;  %v1756_v52 = vmax.f32 %v1754_v26, %v1755_v24  ;;  %v1769_v22 = vrot.slane %v1768_v7, 2 }
  0x95   :  { %v1794_v56 = vsel %vm1352_vm1, %v5342_v18, -inf  ;;  %v1776_v11 = vrot.slane %v1775_v17, 2  ;;  %v1789_v63 = vmax.f32 %v1787_v50, %v1788_v19  ;;  %v1750_v10 = vrot.slane %v1749_v45, 1  ;;  %v2779_v19 = vld [vmem:[%s5245_s3 + $0x78] sm:$0xff] }
  0x96   :  { %v1782_v41 = vmax.f32 %v1780_v51, %v1781_v37  ;;  %v1763_v43 = vmax.f32 %v1761_v0, %v1762_v14  ;;  %v1795_v60 = vrot.slane %v1794_v56, 4  ;;  %v1757_v3 = vrot.slane %v1756_v52, 1 }
  0x97   :  { %v1770_v2 = vmax.f32 %v1768_v7, %v1769_v22  ;;  %v1777_v30 = vmax.f32 %v1775_v17, %v1776_v11  ;;  %v1790_v44 = vrot.slane %v1789_v63, 2  ;;  %v4122_v57 = vmax.f32 %v1749_v45, %v1750_v10  ;;  %v2778_v17 = vld [vmem:[%s5245_s3 + $0x70] sm:$0xff] }
  0x98   :  { %v1783_v4 = vrot.slane %v1782_v41, 2  ;;  %v1764_v8 = vrot.slane %v1763_v43, 1  ;;  %v1796_v51 = vmax.f32 %v1794_v56, %v1795_v60  ;;  %v4124_v40 = vmax.f32 %v1756_v52, %v1757_v3  ;;  %v478_v56 = vld [vmem:[%s5248_s4] sm:$0xff]  ;;  %v479_v52 = vld [vmem:[%s5248_s4 + $0x8] sm:$0xff] }
  0x99   :  { %5343 = vst [vmem:[#allocation35_spill] sm:$0xff] %v4122_v57  ;;  %v1771_v33 = vrot.slane %v1770_v2, 1  ;;  %v1778_v26 = vrot.slane %v1777_v30, 1  ;;  %v1791_v37 = vmax.f32 %v1789_v63, %v1790_v44  ;;  %v1914_v7 = vsel %vm1865_vm2, %v4092_v36, %v4088_v46  ;;  %v2785_v44 = vld [vmem:[%s5245_s3 + $0x88] sm:$0xff]  ;;  %v4463_v36 = vld [vmem:[%s5250_s5 + $0xa0] sm:$0xff]  ;;  %v4505_v46 = vld [vmem:[%s5250_s5 + $0xb0] sm:$0xff] }
  0x9a   :  { %v1784_v25 = vmax.f32 %v1782_v41, %v1783_v4  ;;  %5344 = vst [vmem:[#allocation36_spill] sm:$0xff] %v4124_v40  ;;  %v4126_v24 = vmax.f32 %v1763_v43, %v1764_v8  ;;  %v1797_v0 = vrot.slane %v1796_v51, 2  ;;  %v1915_v18 = vsel %vm1867_vm3, %v4096_v12, %v1914_v7  ;;  %v4458_v12 = vld [vmem:[%s5250_s5 + $0x118] sm:$0xff] }
  0x9b   :  { %v4137_v45 = vmax.f32 %v1770_v2, %v1771_v33  ;;  %v4139_v14 = vmax.f32 %v1777_v30, %v1778_v26  ;;  %v1792_v41 = vrot.slane %v1791_v37, 1  ;;  %v1916_v63 = vsel %vm1869_vm4, %v4108_v16, %v1915_v18  ;;  %v480_v2 = vld [vmem:[%s5248_s4 + $0x10] sm:$0xff]  ;;  %v2784_v30 = vld [vmem:[%s5245_s3 + $0x80] sm:$0xff]  ;;  %v481_v26 = vld [vmem:[%s5248_s4 + $0x18] sm:$0xff] }
  0x9c   :  { %5345 = vst [vmem:[#allocation37_spill] sm:$0xff] %v4126_v24  ;;  %v1785_v50 = vrot.slane %v1784_v25, 1  ;;  %v1798_v11 = vmax.f32 %v1796_v51, %v1797_v0  ;;  %v1921_v10 = vsel %vm1865_vm2, %v4094_v15, %v4090_v20  ;;  %v1917_v4 = vsel %vm1871_vm5, %v4122_v57, %v1916_v63  ;;  %v4453_v16 = vld [vmem:[%s5250_s5 + $0x110] sm:$0xff]  ;;  %v4634_v20 = vld [vmem:[%s5250_s5 + $0xd8] sm:$0xff] }
  0x9d   :  { %5346 = vst [vmem:[#allocation38_spill] sm:$0xff] %v4137_v45  ;;  %5347 = vst [vmem:[#allocation39_spill] sm:$0xff] %v4139_v14  ;;  %v4156_v43 = vmax.f32 %v1791_v37, %v1792_v41  ;;  %v1922_v60 = vsel %vm1867_vm3, %v4101_v55, %v1921_v10  ;;  %v3298_v3 = vpack.c.bf16 %v2779_v19, %v2778_v17  ;;  %v2786_v37 = vld [vmem:[%s5245_s3 + $0x90] sm:$0xff]  ;;  %v2788_v10 = vld [vmem:[%s5245_s3 + $0xa0] sm:$0xff] }
  0x9e   :  { %v4149_v22 = vmax.f32 %v1784_v25, %v1785_v50  ;;  %v1799_v8 = vrot.slane %v1798_v11, 1  ;;  %v1918_v25 = vsel %vm1873_vm6, %v4126_v24, %v1917_v4  ;;  %v1923_v51 = vsel %vm1869_vm4, %v4110_v53, %v1922_v60  ;;  %v2787_v50 = vld [vmem:[%s5245_s3 + $0x98] sm:$0xff]  ;;  %v482_v60 = vld [vmem:[%s5248_s4 + $0x20] sm:$0xff]  ;;  %v4613_v55 = vld [vmem:[%s5250_s5 + $0x1c8] sm:$0xff] }
  0x9f   :  { %5349 = vst [vmem:[#allocation41_spill] sm:$0xff] %v4156_v43  ;;  %v3318_v33 = vpack.c.bf16 %v479_v52, %v478_v56  ;;  %v1919_v0 = vsel %vm1875_vm7, %v4139_v14, %v1918_v25  ;;  %v1924_v7 = vsel %vm1871_vm5, %v4124_v40, %v1923_v51  ;;  %3299 = vmatprep.subr.bf16.mxu1 %v3298_v3  ;;  %v2790_v25 = vld [vmem:[%s5245_s3 + $0xb0] sm:$0xff]  ;;  %v2791_v51 = vld [vmem:[%s5245_s3 + $0xb8] sm:$0xff]  ;;  %5358 = vst [vmem:[#allocation48_spill] sm:$0xff] %v4613_v55 }
  0xa0   :  { %5348 = vst [vmem:[#allocation40_spill] sm:$0xff] %v4149_v22  ;;  %v4188_v17 = vmax.f32 %v1798_v11, %v1799_v8  ;;  %v1920_v19 = vsel %vm1877_vm8, %v4156_v43, %v1919_v0  ;;  %v1925_v41 = vsel %vm1873_vm6, %v4137_v45, %v1924_v7  ;;  %3301 = vmatpush3.bf16.msra.mxu1 %v3298_v3  ;;  %v2789_v11 = vld [vmem:[%s5245_s3 + $0xa8] sm:$0xff]  ;;  %v3534_v7 = vld [vmem:[%s5247_s0 + $0x18] sm:$0xff]  ;;  %v4629_v15 = vld [vmem:[%s5250_s5 + $0xd0] sm:$0xff] }
  0xa1   :  { %v3302_v18 = vpack.c.bf16 %v2785_v44, %v2784_v30  ;;  %v1926_v56 = vsel %vm1875_vm7, %v4149_v22, %v1925_v41  ;;  %3319 = vmatprep.subr.bf16.mxu1 %v3318_v33  ;;  %v3322_v52 = vpack.c.bf16 %v481_v26, %v480_v2  ;;  %v3306_v63 = vpack.c.bf16 %v2787_v50, %v2786_v37  ;;  %v483_v3 = vld [vmem:[%s5248_s4 + $0x28] sm:$0xff]  ;;  %v484_v26 = vld [vmem:[%s5248_s4 + $0x30] sm:$0xff]  ;;  %v4234_v50 = vld [vmem:[%s5249_s1] sm:$0xff] }
  0xa2   :  { %5350 = vst [vmem:[#allocation42_spill] sm:$0xff] %v4188_v17  ;;  %v1927_v4 = vsel %vm1877_vm8, %v4188_v17, %v1926_v56  ;;  %v3532_v30 = vld [vmem:[%s5247_s0 + $0x8] sm:$0xff]  ;;  %v3310_v44 = vpack.c.bf16 %v2789_v11, %v2788_v10  ;;  %v3326_v8 = vpack.c.bf16 %v483_v3, %v482_v60  ;;  %v3533_v37 = vld [vmem:[%s5247_s0 + $0x10] sm:$0xff]  ;;  %v4446_v43 = vld [vmem:[%s5250_s5 + $0x198] sm:$0xff] }
  0xa3   :  { %3303 = vmatprep.subr.bf16.mxu0 %v3302_v18  ;;  %v3503_v2 = vpack.i.bf16 %v1927_v4, %v1920_v19  ;;  %3153 = vmatmul.mubr.msk.f32.vlgmr.msra.gmra.mrb[4].mxu1 %vm100_vm0, %v3532_v30  ;;  %v3314_v19 = vpack.c.bf16 %v2791_v51, %v2790_v25  ;;  %v2802_v56 = vld [vmem:[%s5248_s4 + $0x68] sm:$0xff]  ;;  %v2803_v3 = vld [vmem:[%s5248_s4 + $0x70] sm:$0xff]  ;;  %5361 = vst [vmem:[#allocation51_spill] sm:$0xff] %v4629_v15 }
  0xa4   :  { %3305 = vmatpush3.bf16.msra.mxu0 %v3302_v18  ;;  %3321 = vmatpush3.bf16.msra.mxu1 %v3318_v33  ;;  %v485_v33 = vld [vmem:[%s5248_s4 + $0x38] sm:$0xff]  ;;  %v2801_v18 = vld [vmem:[%s5248_s4 + $0x60] sm:$0xff]  ;;  %v487_v11 = vld [vmem:[%s5248_s4 + $0x48] sm:$0xff] }
  0xa5   :  { %3307 = vmatprep.subr.bf16.mxu0 %v3306_v63  ;;  %3504 = vrot.lane.b32.xlu1 %v3503_v2, %s3536_s22  ;;  %v4236_v0 = vpop.permute.xlu0 %3489  ;;  %v3330_v41 = vpack.c.bf16 %v485_v33, %v484_v26  ;;  %v3342_v4 = vpack.c.bf16 %v2802_v56, %v2801_v18  ;;  %v2804_v2 = vld [vmem:[%s5248_s4 + $0x78] sm:$0xff]  ;;  %v2805_v18 = vld [vmem:[%s5248_s4 + $0x80] sm:$0xff]  ;;  %v2806_v56 = vld [vmem:[%s5248_s4 + $0x88] sm:$0xff] }
  0xa6   :  { %3323 = vmatprep.subr.bf16.mxu1 %v3322_v52  ;;  %3155 = vmatprep.mubr.msk.f32.mxu1 %vm100_vm0, %v3533_v37  ;;  %v5278_v10 = vunpack.i.l.bf16 %v4236_v0  ;;  %v3346_v51 = vpack.c.bf16 %v2804_v2, %v2803_v3  ;;  %v3350_v3 = vpack.c.bf16 %v2806_v56, %v2805_v18  ;;  %v5351_v17 = vunpack.i.h.bf16 %v4236_v0 }
  0xa7   :  { %3156 = vmatmul.mubr.msk.f32.gmra.mrb[6].mxu1 %vm100_vm0, %v3534_v7 }
  0xa8   :  { %3309 = vmatpush3.bf16.msra.mxu0 %v3306_v63  ;;  %3325 = vmatpush3.bf16.msra.mxu1 %v3322_v52  ;;  %v5279_v63 = vunpack.i.h.bf16 %v4236_v0  ;;  %v486_v52 = vld [vmem:[%s5248_s4 + $0x40] sm:$0xff] }
  0xa9   :  { %3311 = vmatprep.subr.bf16.mxu0 %v3310_v44  ;;  %3327 = vmatprep.subr.bf16.mxu1 %v3326_v8  ;;  %v3334_v60 = vpack.c.bf16 %v487_v11, %v486_v52 }
  0xaa   :  { %3204 = vmatprep.mubr.msk.f32.mxu1 %vm490_vm9, %v4234_v50  ;;  %v4269_v25 = vsel %vm1944_vm10, %v5279_v63, %v5278_v10  ;;  %v4426_v10 = vld [vmem:[%s5250_s5 + $0x98] sm:$0xff]  ;;  %v4431_v63 = vld [vmem:[%s5250_s5 + $0x10] sm:$0xff] }
  0xab   :  { %v1966_v26 = vrot.slane %v4269_v25, 1  ;;  %v1968_v52 = vrot.slane %v4269_v25, 2  ;;  %v2086_v18 = vmax.f32 %v3675_v35, %v4269_v25  ;;  %v1972_v56 = vrot.slane %v4269_v25, 4  ;;  %v2822_v35 = vld [vmem:[%s5248_s4 + $0xe8] sm:$0xff] }
  0xac   :  { %3313 = vmatpush3.bf16.msra.mxu0 %v3310_v44  ;;  %3329 = vmatpush3.bf16.msra.mxu1 %v3326_v8  ;;  %v488_v44 = vld [vmem:[%s5248_s4 + $0x50] sm:$0xff]  ;;  %v489_v8 = vld [vmem:[%s5248_s4 + $0x58] sm:$0xff] }
  0xad   :  { %3315 = vmatprep.subr.bf16.mxu0 %v3314_v19  ;;  %3331 = vmatprep.subr.bf16.mxu1 %v3330_v41  ;;  %v3338_v33 = vpack.c.bf16 %v489_v8, %v488_v44  ;;  %v2088_v11 = vmax.f32 %v3679_v29, %v1966_v26  ;;  %v2807_v44 = vld [vmem:[%s5248_s4 + $0x90] sm:$0xff]  ;;  %v2808_v8 = vld [vmem:[%s5248_s4 + $0x98] sm:$0xff] }
  0xae   :  { %v2820_v29 = vld [vmem:[%s5248_s4 + $0xd8] sm:$0xff]  ;;  %v3354_v26 = vpack.c.bf16 %v2808_v8, %v2807_v44 }
  0xb0   :  { %3317 = vmatpush3.bf16.msra.mxu0 %v3314_v19  ;;  %3333 = vmatpush3.bf16.msra.mxu1 %v3330_v41  ;;  %v2817_v19 = vld [vmem:[%s5248_s4 + $0xc0] sm:$0xff]  ;;  %v2818_v41 = vld [vmem:[%s5248_s4 + $0xc8] sm:$0xff] }
  0xb1   :  { %3343 = vmatprep.subr.bf16.mxu0 %v3342_v4  ;;  %3335 = vmatprep.subr.bf16.mxu1 %v3334_v60  ;;  %v3366_v2 = vpack.c.bf16 %v2818_v41, %v2817_v19  ;;  %v2821_v19 = vld [vmem:[%s5248_s4 + $0xe0] sm:$0xff]  ;;  %v4334_v41 = vld [vmem:[%s5249_s1 + $0x10] sm:$0xff] }
  0xb3   :  { %3175 = vmatmul.mubr.msk.f32.vlgmr.msra.gmra.mrb[0].mxu0 %vm100_vm0, %v3532_v30  ;;  %v2090_v30 = vmax.f32 %v3685_v49, %v1968_v52  ;;  %v4314_v49 = vld [vmem:[%s5249_s1 + $0x8] sm:$0xff] }
  0xb4   :  { %3345 = vmatpush3.bf16.msra.mxu0 %v3342_v4  ;;  %3177 = vmatprep.mubr.msk.f32.mxu0 %vm100_vm0, %v3533_v37  ;;  %v2819_v37 = vld [vmem:[%s5248_s4 + $0xd0] sm:$0xff]  ;;  %v1970_v4 = vrot.slane %v4269_v25, 3 }
  0xb5   :  { %3337 = vmatpush3.bf16.msra.mxu1 %v3334_v60  ;;  %3347 = vmatprep.subr.bf16.mxu0 %v3346_v51  ;;  %v2261_v60 = vrot.slane %v2088_v11, 7  ;;  %v2263_v52 = vrot.slane %v2090_v30, 6  ;;  %v4343_v30 = vld [vmem:[%s5249_s1 + $0x18] sm:$0xff] }
  0xb6   :  { %3339 = vmatprep.subr.bf16.mxu1 %v3338_v33  ;;  %v2092_v11 = vmax.f32 %v3707_v48, %v1970_v4  ;;  %v2811_v48 = vld [vmem:[%s5248_s4 + $0xb0] sm:$0xff] }
  0xb7   :  { %3178 = vmatmul.mubr.msk.f32.gmra.mrb[2].mxu0 %vm100_vm0, %v3534_v7  ;;  %v3370_v7 = vpack.c.bf16 %v2820_v29, %v2819_v37  ;;  %v2262_v44 = vsel %vm1865_vm2, %v2261_v60, %v2086_v18  ;;  %v1974_v37 = vrot.slane %v4269_v25, 5  ;;  %v3374_v29 = vpack.c.bf16 %v2822_v35, %v2821_v19  ;;  %v2823_v60 = vld [vmem:[%s5248_s4 + $0xf0] sm:$0xff]  ;;  %v2824_v18 = vld [vmem:[%s5248_s4 + $0xf8] sm:$0xff] }
  0xb8   :  { %3349 = vmatpush3.bf16.msra.mxu0 %v3346_v51  ;;  %3234 = vmatprep.mubr.msk.f32.mxu0 %vm490_vm9, %v4234_v50  ;;  %v2809_v51 = vld [vmem:[%s5248_s4 + $0xa0] sm:$0xff]  ;;  %v2264_v4 = vsel %vm1867_vm3, %v2263_v52, %v2262_v44  ;;  %v3378_v35 = vpack.c.bf16 %v2824_v18, %v2823_v60  ;;  %v4415_v60 = vld [vmem:[%s5250_s5 + $0x108] sm:$0xff]  ;;  %v1978_v18 = vrot.slane %v4269_v25, 7 }
  0xb9   :  { %3341 = vmatpush3.bf16.msra.mxu1 %v3338_v33  ;;  %3351 = vmatprep.subr.bf16.mxu0 %v3350_v3  ;;  %v2810_v33 = vld [vmem:[%s5248_s4 + $0xa8] sm:$0xff]  ;;  %v2096_v19 = vmax.f32 %v3730_v39, %v1974_v37  ;;  %v2167_v44 = vld [vmem:[%s5250_s5 + $0x80] sm:$0xff] }
  0xba   :  { %3367 = vmatprep.subr.bf16.mxu1 %v3366_v2  ;;  %v3358_v8 = vpack.c.bf16 %v2810_v33, %v2809_v51  ;;  %v2265_v51 = vrot.slane %v2092_v11, 5  ;;  %v1976_v33 = vrot.slane %v4269_v25, 6  ;;  %v2828_v11 = vld [vmem:[%s5248_s4 + $0x118] sm:$0xff]  ;;  %v2168_v39 = vld [vmem:[%s5250_s5 + $0x88] sm:$0xff]  ;;  %v2100_v22 = vmax.f32 %v3772_v6, %v1978_v18  ;;  %v4530_v6 = vld [vmem:[%s5250_s5 + $0x30] sm:$0xff] }
  0xbb   :  { %v4436_v25 = vld [vmem:[%s5250_s5 + $0x18] sm:$0xff]  ;;  %v3390_v57 = vpack.c.bf16 %v2168_v39, %v2167_v44  ;;  %v4478_v44 = vld [vmem:[%s5250_s5 + $0x28] sm:$0xff]  ;;  %v4483_v39 = vld [vmem:[%s5250_s5 + $0x1a0] sm:$0xff] }
  0xbc   :  { %3205 = vmatmul.mubr.msk.f32.vlgmr.msra.gmra.mrb[8].mxu1 %vm490_vm9, %v4314_v49  ;;  %3353 = vmatpush3.bf16.msra.mxu0 %v3350_v3  ;;  %v2812_v3 = vld [vmem:[%s5248_s4 + $0xb8] sm:$0xff]  ;;  %v2098_v14 = vmax.f32 %v3753_v61, %v1976_v33  ;;  %v4468_v61 = vld [vmem:[%s5250_s5 + $0xa8] sm:$0xff]  ;;  %v4546_v18 = vld [vmem:[%s5250_s5 + $0x1b0] sm:$0xff] }
  0xbd   :  { %3369 = vmatpush3.bf16.msra.mxu1 %v3366_v2  ;;  %3355 = vmatprep.subr.bf16.mxu0 %v3354_v26  ;;  %v2094_v2 = vmax.f32 %v3725_v28, %v1972_v56  ;;  %v2825_v28 = vld [vmem:[%s5248_s4 + $0x100] sm:$0xff]  ;;  %v2826_v56 = vld [vmem:[%s5248_s4 + $0x108] sm:$0xff]  ;;  %v3362_v52 = vpack.c.bf16 %v2812_v3, %v2811_v48  ;;  %5353 = vst [vmem:[#allocation43_spill] sm:$0xff] %v4546_v18 }
  0xbe   :  { %3371 = vmatprep.subr.bf16.mxu1 %v3370_v7  ;;  %3207 = vmatprep.mubr.msk.f32.mxu1 %vm490_vm9, %v4334_v41  ;;  %v4390_v48 = vld [vmem:[%s5250_s5] sm:$0xff]  ;;  %v4395_v3 = vld [vmem:[%s5250_s5 + $0x8] sm:$0xff]  ;;  %v3382_v33 = vpack.c.bf16 %v2826_v56, %v2825_v28 }
  0xbf   :  { %v2267_v37 = vrot.slane %v2094_v2, 4  ;;  %v4410_v2 = vld [vmem:[%s5250_s5 + $0x100] sm:$0xff]  ;;  %v3392_v40 = vpack.c.bf16 %v4395_v3, %v4390_v48  ;;  %v3396_v48 = vpack.c.bf16 %v4436_v25, %v4431_v63 }
  0xc0   :  { %3357 = vmatpush3.bf16.msra.mxu0 %v3354_v26  ;;  %3208 = vmatmul.mubr.msk.f32.gmra.mrb[10].mxu1 %vm490_vm9, %v4343_v30  ;;  %v2266_v26 = vsel %vm1869_vm4, %v2265_v51, %v2264_v4  ;;  %v4405_v4 = vld [vmem:[%s5250_s5 + $0x188] sm:$0xff]  ;;  %v4421_v51 = vld [vmem:[%s5250_s5 + $0x90] sm:$0xff]  ;;  %v4495_v56 = vld [vmem:[%s5250_s5 + $0x120] sm:$0xff] }
  0xc1   :  { %3373 = vmatpush3.bf16.msra.mxu1 %v3370_v7  ;;  %3359 = vmatprep.subr.bf16.mxu0 %v3358_v8  ;;  %v2827_v7 = vld [vmem:[%s5248_s4 + $0x110] sm:$0xff]  ;;  %v2268_v24 = vsel %vm1871_vm5, %v2267_v37, %v2266_v26  ;;  %v4473_v26 = vld [vmem:[%s5250_s5 + $0x20] sm:$0xff]  ;;  %v4500_v37 = vld [vmem:[%s5250_s5 + $0x128] sm:$0xff] }
  0xc2   :  { %3375 = vmatprep.subr.bf16.mxu1 %v3374_v29  ;;  %3264 = vmatprep.mubr.msk.f32.mxu1 %vm490_vm9, %v4234_v50  ;;  %v4400_v50 = vld [vmem:[%s5250_s5 + $0x180] sm:$0xff]  ;;  %v4490_v28 = vpack.c.bf16 %v2828_v11, %v2827_v7  ;;  %v5352_v7 = vunpack.i.l.bf16 %v4236_v0  ;;  %v4525_v0 = vld [vmem:[%s5250_s5 + $0xb8] sm:$0xff] }
  0xc3   :  { %v4571_v25 = vld [vmem:[%s5250_s5 + $0xc0] sm:$0xff] }
  0xc4   :  { %3361 = vmatpush3.bf16.msra.mxu0 %v3358_v8  ;;  %v4441_v8 = vld [vmem:[%s5250_s5 + $0x190] sm:$0xff]  ;;  %v4512_v11 = vsel %vm1944_vm10, %v5352_v7, %v5351_v17  ;;  %v2271_v17 = vrot.slane %v2098_v14, 2  ;;  %v4551_v14 = vld [vmem:[%s5250_s5 + $0x1b8] sm:$0xff]  ;;  %v4590_v3 = vld [vmem:[%s5250_s5 + $0x40] sm:$0xff] }
  0xc5   :  { %3377 = vmatpush3.bf16.msra.mxu1 %v3374_v29  ;;  %3363 = vmatprep.subr.bf16.mxu0 %v3362_v52  ;;  %v2269_v29 = vrot.slane %v2096_v19, 3  ;;  %v4488_v19 = vld [vmem:[%s5250_s5 + $0x1a8] sm:$0xff]  ;;  %5354 = vst [vmem:[#allocation44_spill] sm:$0xff] %v4551_v14 }
  0xc6   :  { %3379 = vmatprep.subr.bf16.mxu1 %v3378_v35 }
  0xc7   :  { %v2270_v45 = vsel %vm1873_vm6, %v2269_v29, %v2268_v24  ;;  %v4535_v24 = vld [vmem:[%s5250_s5 + $0x38] sm:$0xff]  ;;  %v4576_v29 = vld [vmem:[%s5250_s5 + $0xc8] sm:$0xff] }
  0xc8   :  { %3365 = vmatpush3.bf16.msra.mxu0 %v3362_v52  ;;  %v3394_v52 = vpack.c.bf16 %v4426_v10, %v4421_v51  ;;  %v3398_v10 = vpack.c.bf16 %v4468_v61, %v4463_v36  ;;  %v1965_v51 = vrot.slane %v4512_v11, 1  ;;  %v2272_v7 = vsel %vm1875_vm7, %v2271_v17, %v2270_v45  ;;  %v4595_v45 = vld [vmem:[%s5250_s5 + $0x48] sm:$0xff] }
  0xc9   :  { %3381 = vmatpush3.bf16.msra.mxu1 %v3378_v35  ;;  %3391 = vmatprep.subr.bf16.mxu0 %v3390_v57  ;;  %v4556_v57 = vld [vmem:[%s5250_s5 + $0x130] sm:$0xff]  ;;  %v4565_v35 = vld [vmem:[%s5250_s5 + $0x138] sm:$0xff]  ;;  %v3400_v36 = vpack.c.bf16 %v4478_v44, %v4473_v26  ;;  %v4600_v26 = vld [vmem:[%s5250_s5 + $0x1c0] sm:$0xff]  ;;  %v2273_v44 = vrot.slane %v2100_v22, 1  ;;  %v1967_v61 = vrot.slane %v4512_v11, 2 }
  0xca   :  { %5355 = vst [vmem:[#allocation45_spill] sm:$0xff] %v4556_v57  ;;  %3383 = vmatprep.subr.bf16.mxu1 %v3382_v33  ;;  %5356 = vst [vmem:[#allocation46_spill] sm:$0xff] %v4565_v35  ;;  %v4618_v22 = vld [vmem:[%s5250_s5 + $0x140] sm:$0xff]  ;;  %v2087_v18 = vmax.f32 %v3677_v38, %v1965_v51 }
  0xcb   :  { %3235 = vmatmul.mubr.msk.f32.vlgmr.msra.gmra.mrb[4].mxu0 %vm490_vm9, %v4314_v49  ;;  %5357 = vst [vmem:[#allocation47_spill] sm:$0xff] %v4600_v26  ;;  %5359 = vst [vmem:[#allocation49_spill] sm:$0xff] %v4618_v22  ;;  %v3495_v17 = vpop.permute.xlu0 %3494  ;;  %v4637_v9 = vsel %vm1877_vm8, %v2273_v44, %v2272_v7  ;;  %v4691_v7 = vld [vmem:[%s5250_s5 + $0xe0] sm:$0xff]  ;;  %v4696_v22 = vld [vmem:[%s5250_s5 + $0xe8] sm:$0xff]  ;;  %v2089_v26 = vmax.f32 %v3681_v42, %v1967_v61 }
  0xcc   :  { %3237 = vmatprep.mubr.msk.f32.mxu0 %vm490_vm9, %v4334_v41  ;;  %3393 = vmatpush3.bf16.msra.mxu0 %v3392_v40  ;;  %v4623_v40 = vld [vmem:[%s5250_s5 + $0x148] sm:$0xff]  ;;  %v3497_v63 = vunpack.i.h.bf16 %v3495_v17  ;;  %v3496_v53 = vunpack.i.l.bf16 %v3495_v17  ;;  %v3406_v17 = vpack.c.bf16 %v4576_v29, %v4571_v25  ;;  %v4669_v25 = vld [vmem:[%s5250_s5 + $0x58] sm:$0xff]  ;;  %v4674_v29 = vld [vmem:[%s5250_s5 + $0x1d0] sm:$0xff] }
  0xcd   :  { %5360 = vst [vmem:[#allocation50_spill] sm:$0xff] %v4623_v40  ;;  %3385 = vmatpush3.bf16.msra.mxu1 %v3382_v33  ;;  %3395 = vmatprep.subr.bf16.mxu0 %v3394_v52  ;;  %v2085_v52 = vmax.f32 %v3673_v31, %v4512_v11  ;;  %v4661_v31 = vld [vmem:[%s5250_s5 + $0x50] sm:$0xff]  ;;  %v4679_v33 = vld [vmem:[%s5250_s5 + $0x1d8] sm:$0xff]  ;;  %v1971_v40 = vrot.slane %v4512_v11, 4 }
  0xce   :  { %3387 = vmatprep.subr.bf16.mxu1 %v4490_v28  ;;  %v4656_v57 = vsel %vm1944_vm10, %v3497_v63, %v3496_v53  ;;  %v4686_v51 = vsel %vm1944_vm10, %v3496_v53, %v3497_v63  ;;  %v5362_v53 = vpack.c.bf16 %v4405_v4, %v4400_v50  ;;  %v1973_v63 = vrot.slane %v4512_v11, 5 }
  0xcf   :  { %3238 = vmatmul.mubr.msk.f32.gmra.mrb[6].mxu0 %vm490_vm9, %v4343_v30  ;;  %v1980_v38 = vrot.slane %v4656_v57, 1  ;;  %v1982_v44 = vrot.slane %v4656_v57, 2  ;;  %v3412_v14 = vpack.c.bf16 %v4669_v25, %v4661_v31  ;;  %v3442_v15 = vpack.c.bf16 %v4679_v33, %v4674_v29  ;;  %v2165_v25 = vld [vmem:[%s5250_s5 + $0x70] sm:$0xff] }
  0xd0   :  { %3397 = vmatpush3.bf16.msra.mxu0 %v3396_v48  ;;  %2431 = vmatprep.mubr.f32.mxu0 %v4637_v9  ;;  %v1969_v48 = vrot.slane %v4512_v11, 3  ;;  %v1986_v42 = vrot.slane %v4656_v57, 4  ;;  %v2102_v61 = vmax.f32 %v3820_v58, %v4656_v57  ;;  %v1979_v50 = vrot.slane %v4686_v51, 1 }
  0xd1   :  { %3389 = vmatpush3.bf16.msra.mxu1 %v4490_v28  ;;  %3399 = vmatprep.subr.bf16.mxu0 %v3398_v10  ;;  %v1984_v28 = vrot.slane %v4656_v57, 3  ;;  %v2247_v10 = vrot.slane %v2087_v18, 7  ;;  %v2104_v55 = vmax.f32 %v3824_v21, %v1980_v38  ;;  %v2106_v35 = vmax.f32 %v3830_v1, %v1982_v44 }
  0xd2   :  { %3423 = vmatprep.subr.bf16.mxu1 %v5362_v53  ;;  %v3414_v21 = vpack.c.bf16 %v4696_v22, %v4691_v7  ;;  %v1981_v4 = vrot.slane %v4686_v51, 2  ;;  %v5363_v18 = vpack.c.bf16 %v4415_v60, %v4410_v2  ;;  %v2091_v58 = vmax.f32 %v3691_v54, %v1969_v48  ;;  %v2882_v22 = vld [vmem:[%s5250_s5 + $0x280] sm:$0xff]  ;;  %v2883_v7 = vld [vmem:[%s5250_s5 + $0x288] sm:$0xff] }
  0xd3   :  { %v2289_v1 = vrot.slane %v2104_v55, 7  ;;  %v2108_v44 = vmax.f32 %v3844_v13, %v1984_v28  ;;  %v5364_v38 = vpack.c.bf16 %v4446_v43, %v4441_v8  ;;  %v5365_v55 = vpack.c.bf16 %v4525_v0, %v4505_v46 }
  0xd4   :  { %3265 = vmatmul.mubr.msk.f32.vlgmr.msra.gmra.mrb[12].mxu1 %vm490_vm9, %v4314_v49  ;;  %3401 = vmatpush3.bf16.msra.mxu0 %v3400_v36  ;;  %v2093_v49 = vmax.f32 %v3719_v23, %v1971_v40  ;;  %v2249_v36 = vrot.slane %v2089_v26, 6  ;;  %v2248_v2 = vsel %vm1865_vm2, %v2247_v10, %v2085_v52  ;;  %v2291_v60 = vrot.slane %v2106_v35, 6 }
  0xd5   :  { %3267 = vmatprep.mubr.msk.f32.mxu1 %vm490_vm9, %v4334_v41  ;;  %3425 = vmatpush3.bf16.msra.mxu1 %v5363_v18  ;;  %v4735_v41 = vmax.f32 %v3728_v34, %v1973_v63  ;;  %v1983_v54 = vrot.slane %v4686_v51, 3  ;;  %v1988_v23 = vrot.slane %v4656_v57, 5  ;;  %v2110_v13 = vmax.f32 %v3854_v32, %v1986_v42 }
  0xd6   :  { %3427 = vmatprep.subr.bf16.mxu1 %v5364_v38  ;;  %3403 = vmatprep.subr.bf16.mxu0 %v5365_v55  ;;  %v2290_v26 = vsel %vm1865_vm2, %v2289_v1, %v2102_v61  ;;  %v1985_v43 = vrot.slane %v4686_v51, 4  ;;  %v5366_v34 = vpack.c.bf16 %v4535_v24, %v4530_v6  ;;  %v1975_v46 = vrot.slane %v4512_v11, 6  ;;  %v5372_v1 = vld [vmem:[#allocation51_spill] sm:$0xff]  ;;  %v5378_v55 = vld [vmem:[#allocation6_spill] sm:$0xff] }
  0xd7   :  { %v2101_v8 = vmax.f32 %v3818_v47, %v4686_v51  ;;  %v2103_v0 = vmax.f32 %v3822_v59, %v1979_v50  ;;  %v2105_v32 = vmax.f32 %v3826_v62, %v1981_v4  ;;  %v5367_v35 = vpack.c.bf16 %v4458_v12, %v4453_v16  ;;  %v2163_v16 = vld [vmem:[%s5250_s5 + $0x60] sm:$0xff] }
  0xd8   :  { %3268 = vmatmul.mubr.msk.f32.gmra.mrb[14].mxu1 %vm490_vm9, %v4343_v30  ;;  %3405 = vmatpush3.bf16.msra.mxu0 %v5366_v34  ;;  %v2250_v30 = vsel %vm1867_vm3, %v2249_v36, %v2248_v2  ;;  %v2251_v40 = vrot.slane %v2091_v58, 5  ;;  %v2293_v52 = vrot.slane %v2108_v44, 5  ;;  %v2107_v6 = vmax.f32 %v3838_v5, %v1983_v54  ;;  %v2164_v5 = vld [vmem:[%s5250_s5 + $0x68] sm:$0xff]  ;;  %v5374_v58 = vld [vmem:[#allocation44_spill] sm:$0xff] }
  0xd9   :  { %3429 = vmatpush3.bf16.msra.mxu1 %v5367_v35  ;;  %3407 = vmatprep.subr.bf16.mxu0 %v3406_v17  ;;  %v5368_v24 = vpack.c.bf16 %v4488_v19, %v4483_v39  ;;  %v1990_v47 = vrot.slane %v4656_v57, 6  ;;  %v2292_v59 = vsel %vm1867_vm3, %v2291_v60, %v2290_v26  ;;  %v1987_v62 = vrot.slane %v4686_v51, 5  ;;  %v5369_v19 = vld [vmem:[#allocation5_spill] sm:$0xff]  ;;  %v5379_v60 = vld [vmem:[#allocation3_spill] sm:$0xff] }
  0xda   :  { %2549 = vmatprep.mubr.f32.mxu1 %v4637_v9  ;;  %v2275_v12 = vrot.slane %v2103_v0, 7  ;;  %v2253_v17 = vrot.slane %v2093_v49, 4  ;;  %v2112_v39 = vmax.f32 %v3870_v27, %v1988_v23  ;;  %v2109_v48 = vmax.f32 %v5369_v19, %v1985_v43  ;;  %v5375_v49 = vld [vmem:[#allocation43_spill] sm:$0xff]  ;;  %v2844_v43 = vld [vmem:[%s5250_s5 + $0x150] sm:$0xff]  ;;  %v5380_v0 = vld [vmem:[#allocation46_spill] sm:$0xff] }
  0xdb   :  { %3431 = vmatprep.subr.bf16.mxu1 %v5368_v24  ;;  %v2277_v28 = vrot.slane %v2105_v32, 6  ;;  %v5370_v53 = vpack.c.bf16 %v4595_v45, %v4590_v3  ;;  %v2252_v63 = vsel %vm1869_vm4, %v2251_v40, %v2250_v30  ;;  %v2295_v10 = vrot.slane %v2110_v13, 4  ;;  %v5381_v32 = vld [vmem:[#allocation45_spill] sm:$0xff]  ;;  %v5384_v40 = vld [vmem:[#allocation7_spill] sm:$0xff] }
  0xdc   :  { %v2276_v42 = vsel %vm1865_vm2, %v2275_v12, %v2101_v8  ;;  %v2279_v61 = vrot.slane %v2107_v6, 5  ;;  %v5371_v50 = vpack.c.bf16 %v4500_v37, %v4495_v56  ;;  %v5373_v27 = vpack.c.bf16 %v4634_v20, %v5372_v1  ;;  %v2181_v56 = vld [vmem:[%s5250_s5 + $0xf0] sm:$0xff]  ;;  %v2182_v20 = vld [vmem:[%s5250_s5 + $0xf8] sm:$0xff]  ;;  %v5386_v24 = vld [vmem:[#allocation47_spill] sm:$0xff] }
  0xdd   :  { %3409 = vmatpush3.bf16.msra.mxu0 %v5370_v53  ;;  %v1992_v4 = vrot.slane %v4656_v57, 7  ;;  %v2294_v18 = vsel %vm1869_vm4, %v2293_v52, %v2292_v59  ;;  %v1989_v3 = vrot.slane %v4686_v51, 6  ;;  %v2278_v45 = vsel %vm1867_vm3, %v2277_v28, %v2276_v42  ;;  %v5377_v57 = vld [vmem:[#allocation8_spill] sm:$0xff]  ;;  %v2846_v53 = vld [vmem:[%s5250_s5 + $0x160] sm:$0xff] }
  0xde   :  { %3433 = vmatpush3.bf16.msra.mxu1 %v5371_v50  ;;  %3411 = vmatprep.subr.bf16.mxu0 %v5373_v27  ;;  %v5376_v36 = vpack.c.bf16 %v5374_v58, %v5375_v49  ;;  %v3416_v44 = vpack.c.bf16 %v2164_v5, %v2163_v16  ;;  %v1977_v37 = vrot.slane %v4512_v11, 7  ;;  %v2114_v38 = vmax.f32 %v5377_v57, %v1990_v47  ;;  %v5385_v6 = vld [vmem:[#allocation48_spill] sm:$0xff]  ;;  %v2862_v5 = vld [vmem:[%s5250_s5 + $0x1e0] sm:$0xff]  ;;  %v5391_v50 = vld [vmem:[#allocation49_spill] sm:$0xff] }
  0xdf   :  { %v2111_v2 = vmax.f32 %v5378_v55, %v1987_v62  ;;  %v2097_v54 = vmax.f32 %v5379_v60, %v1975_v46  ;;  %v2254_v23 = vsel %vm1871_vm5, %v2253_v17, %v2252_v63  ;;  %v2297_v13 = vrot.slane %v2112_v39, 3  ;;  %v2863_v17 = vld [vmem:[%s5250_s5 + $0x1e8] sm:$0xff]  ;;  %v2848_v60 = vld [vmem:[%s5250_s5 + $0x170] sm:$0xff] }
  0xe0   :  { %3435 = vmatprep.subr.bf16.mxu1 %v5376_v36  ;;  %v2281_v26 = vrot.slane %v2109_v48, 4  ;;  %v2255_v11 = vrot.slane %v4735_v41, 3  ;;  %v2296_v34 = vsel %vm1871_vm5, %v2295_v10, %v2294_v18  ;;  %v1991_v8 = vrot.slane %v4686_v51, 7  ;;  %v2166_v51 = vld [vmem:[%s5250_s5 + $0x78] sm:$0xff]  ;;  %v5383_v41 = vld [vmem:[#allocation10_spill] sm:$0xff]  ;;  %v2847_v27 = vld [vmem:[%s5250_s5 + $0x168] sm:$0xff] }
  0xe1   :  { %3413 = vmatpush3.bf16.msra.mxu0 %v3412_v14  ;;  %v2280_v46 = vsel %vm1869_vm4, %v2279_v61, %v2278_v45  ;;  %v5382_v35 = vpack.c.bf16 %v5380_v0, %v5381_v32  ;;  %v2845_v14 = vld [vmem:[%s5250_s5 + $0x158] sm:$0xff]  ;;  %v3418_v31 = vpack.c.bf16 %v2182_v20, %v2181_v56  ;;  %v2116_v30 = vmax.f32 %v5383_v41, %v1992_v4  ;;  %v5390_v61 = vld [vmem:[#allocation50_spill] sm:$0xff]  ;;  %v2867_v45 = vld [vmem:[%s5250_s5 + $0x208] sm:$0xff] }
  0xe2   :  { %3415 = vmatprep.subr.bf16.mxu0 %v3414_v21  ;;  %v2113_v52 = vmax.f32 %v5384_v40, %v1989_v3  ;;  %v5387_v47 = vpack.c.bf16 %v5385_v6, %v5386_v24  ;;  %v5388_v21 = vld [vmem:[#allocation4_spill] sm:$0xff]  ;;  %v2256_v62 = vsel %vm1873_vm6, %v2255_v11, %v2254_v23  ;;  %v2299_v12 = vrot.slane %v2114_v38, 2  ;;  %v5389_v10 = vld [vmem:[#allocation9_spill] sm:$0xff]  ;;  %v2866_v3 = vld [vmem:[%s5250_s5 + $0x200] sm:$0xff] }
  0xe3   :  { %3437 = vmatpush3.bf16.msra.mxu1 %v5382_v35  ;;  %v2099_v59 = vmax.f32 %v5388_v21, %v1977_v37  ;;  %v2283_v16 = vrot.slane %v2111_v2, 3  ;;  %v2257_v39 = vrot.slane %v2097_v54, 2  ;;  %v2298_v19 = vsel %vm1873_vm6, %v2297_v13, %v2296_v34  ;;  %v2884_v20 = vld [vmem:[%s5250_s5 + $0x290] sm:$0xff]  ;;  %v2885_v37 = vld [vmem:[%s5250_s5 + $0x298] sm:$0xff]  ;;  %v2887_v0 = vld [vmem:[%s5250_s5 + $0x2a8] sm:$0xff] }
  0xe4   :  { %3439 = vmatprep.subr.bf16.mxu1 %v5387_v47  ;;  %v2282_v48 = vsel %vm1871_vm5, %v2281_v26, %v2280_v46  ;;  %v3444_v28 = vpack.c.bf16 %v2845_v14, %v2844_v43  ;;  %v3420_v63 = vpack.c.bf16 %v2166_v51, %v2165_v25  ;;  %v2115_v42 = vmax.f32 %v5389_v10, %v1991_v8  ;;  %v2864_v38 = vld [vmem:[%s5250_s5 + $0x1f0] sm:$0xff]  ;;  %v2869_v43 = vld [vmem:[%s5250_s5 + $0x218] sm:$0xff]  ;;  %v2886_v46 = vld [vmem:[%s5250_s5 + $0x2a0] sm:$0xff] }
  0xe5   :  { %3417 = vmatpush3.bf16.msra.mxu0 %v3416_v44  ;;  %v5392_v1 = vpack.c.bf16 %v5390_v61, %v5391_v50  ;;  %v3454_v4 = vpack.c.bf16 %v2883_v7, %v2882_v22  ;;  %v2258_v18 = vsel %vm1875_vm7, %v2257_v39, %v2256_v62  ;;  %v2301_v58 = vrot.slane %v2116_v30, 1  ;;  %v2868_v26 = vld [vmem:[%s5250_s5 + $0x210] sm:$0xff]  ;;  %v2849_v8 = vld [vmem:[%s5250_s5 + $0x178] sm:$0xff]  ;;  %v2871_v25 = vld [vmem:[%s5250_s5 + $0x228] sm:$0xff] }
  0xe6   :  { %3419 = vmatprep.subr.bf16.mxu0 %v3418_v31  ;;  %v2285_v49 = vrot.slane %v2113_v52, 2  ;;  %v3446_v36 = vpack.c.bf16 %v2863_v17, %v2862_v5  ;;  %v2259_v44 = vrot.slane %v2099_v59, 1  ;;  %v2300_v56 = vsel %vm1875_vm7, %v2299_v12, %v2298_v19  ;;  %v2870_v31 = vld [vmem:[%s5250_s5 + $0x220] sm:$0xff]  ;;  %v2888_v51 = vld [vmem:[%s5250_s5 + $0x2b0] sm:$0xff]  ;;  %v2889_v40 = vld [vmem:[%s5250_s5 + $0x2b8] sm:$0xff] }
  0xe7   :  { %3441 = vmatpush3.bf16.msra.mxu1 %v5392_v1  ;;  %v2284_v57 = vsel %vm1873_vm6, %v2283_v16, %v2282_v48  ;;  %v3448_v33 = vpack.c.bf16 %v2847_v27, %v2846_v53  ;;  %v3456_v55 = vpack.c.bf16 %v2867_v45, %v2866_v3  ;;  %v2287_v2 = vrot.slane %v2115_v42, 1  ;;  %v4898_v11 = vpop.f32.mrb[0].mxu1  ;;  %v2872_v52 = vld [vmem:[%s5250_s5 + $0x230] sm:$0xff]  ;;  %v2873_v6 = vld [vmem:[%s5250_s5 + $0x238] sm:$0xff]  ;;  %v2890_v24 = vld [vmem:[%s5250_s5 + $0x2c0] sm:$0xff] }
  0xe8   :  { %3443 = vmatprep.subr.bf16.mxu1 %v3442_v15  ;;  %v2865_v15 = vld [vmem:[%s5250_s5 + $0x1f8] sm:$0xff]  ;;  %v4883_v29 = vsel %vm1877_vm8, %v2259_v44, %v2258_v18  ;;  %v4889_v54 = vsel %vm1877_vm8, %v2301_v58, %v2300_v56  ;;  %v3458_v23 = vpack.c.bf16 %v2885_v37, %v2884_v20  ;;  %v2286_v13 = vsel %vm1875_vm7, %v2285_v49, %v2284_v57  ;;  %v4909_v32 = vpop.f32.mrb[1].mxu1  ;;  %v2891_v47 = vld [vmem:[%s5250_s5 + $0x2c8] sm:$0xff]  ;;  %v4943_v22 = vld [vmem:[%s5250_s5 + $0x240] sm:$0xff] }
  0xe9   :  { %3421 = vmatpush3.bf16.msra.mxu0 %v3420_v63  ;;  %v3450_v34 = vpack.c.bf16 %v2865_v15, %v2864_v38  ;;  %v4914_v35 = vsel %vm1877_vm8, %v2287_v2, %v2286_v13  ;;  %v3460_v14 = vpack.c.bf16 %v2869_v43, %v2868_v26  ;;  %v3452_v41 = vpack.c.bf16 %v2849_v8, %v2848_v60  ;;  %v4949_v7 = vld [vmem:[%s5250_s5 + $0x248] sm:$0xff]  ;;  %v4954_v21 = vld [vmem:[%s5250_s5 + $0x2d0] sm:$0xff]  ;;  %v4959_v59 = vld [vmem:[%s5250_s5 + $0x2d8] sm:$0xff] }
  0xea   :  { %3455 = vmatprep.subr.bf16.mxu0 %v3454_v4  ;;  %v3462_v30 = vpack.c.bf16 %v2887_v0, %v2886_v46  ;;  %v3464_v62 = vpack.c.bf16 %v2871_v25, %v2870_v31  ;;  %v4964_v12 = vld [vmem:[%s5250_s5 + $0x250] sm:$0xff]  ;;  %v4969_v16 = vld [vmem:[%s5250_s5 + $0x258] sm:$0xff]  ;;  %v4974_v5 = vld [vmem:[%s5250_s5 + $0x2e0] sm:$0xff]  ;;  %v3466_v17 = vpack.c.bf16 %v2889_v40, %v2888_v51  ;;  %v3468_v53 = vpack.c.bf16 %v2873_v6, %v2872_v52 }
  0xeb   :  { %3445 = vmatpush3.bf16.msra.mxu1 %v3444_v28  ;;  %v4979_v39 = vld [vmem:[%s5250_s5 + $0x2e8] sm:$0xff]  ;;  %v4984_v19 = vld [vmem:[%s5250_s5 + $0x260] sm:$0xff]  ;;  %v3470_v63 = vpack.c.bf16 %v2891_v47, %v2890_v24  ;;  %v3472_v61 = vpack.c.bf16 %v4949_v7, %v4943_v22  ;;  %v3474_v50 = vpack.c.bf16 %v4959_v59, %v4954_v21  ;;  %v3476_v1 = vpack.c.bf16 %v4969_v16, %v4964_v12  ;;  %v5393_v38 = vld [vmem:[#allocation12_spill] sm:$0xff] }
  0xec   :  { %3447 = vmatprep.subr.bf16.mxu1 %v3446_v36  ;;  %2432 = vmatmul.mubr.f32.vlgmr.msra.gmra.mrb[8].mxu0 %v4883_v29  ;;  %v4989_v48 = vld [vmem:[%s5250_s5 + $0x268] sm:$0xff]  ;;  %v3478_v27 = vpack.c.bf16 %v4979_v39, %v4974_v5  ;;  %v392_v45 = vrot.slane %v4898_v11, 7  ;;  %v391_v58 = vrot.slane %v4909_v32, 7  ;;  %v5395_v2 = vld [vmem:[#allocation16_spill] sm:$0xff]  ;;  %v2881_v16 = vld [vmem:[%s5250_s5 + $0x278] sm:$0xff] }
  0xed   :  { %3457 = vmatpush3.bf16.msra.mxu0 %v3456_v55  ;;  %2436 = vmatprep.mubr.f32.mxu0 %v4889_v54  ;;  %v3480_v4 = vpack.c.bf16 %v4989_v48, %v4984_v19  ;;  %v5397_v26 = vld [vmem:[#allocation20_spill] sm:$0xff] }
  0xee   :  { %3459 = vmatprep.subr.bf16.mxu0 %v3458_v23  ;;  %v5396_v23 = vld [vmem:[#allocation18_spill] sm:$0xff]  ;;  %v5399_v46 = vld [vmem:[#allocation24_spill] sm:$0xff] }
  0xef   :  { %3449 = vmatpush3.bf16.msra.mxu1 %v3448_v33  ;;  %v5394_v33 = vld [vmem:[#allocation14_spill] sm:$0xff]  ;;  %v2880_v12 = vld [vmem:[%s5250_s5 + $0x270] sm:$0xff] }
  0xf0   :  { %3451 = vmatprep.subr.bf16.mxu1 %v3450_v34  ;;  %2437 = vmatmul.mubr.f32.gmra.mrb[10].mxu0 %v4914_v35  ;;  %v5398_v34 = vld [vmem:[#allocation22_spill] sm:$0xff] }
  0xf1   :  { %3461 = vmatpush3.bf16.msra.mxu0 %v3460_v14  ;;  %v3500_v28 = vpop.permute.xlu1 %3499  ;;  %v5400_v14 = vld [vmem:[#allocation26_spill] sm:$0xff] }
  0xf2   :  { %3463 = vmatprep.subr.bf16.mxu0 %v3462_v30  ;;  %v3502_v10 = vunpack.i.h.bf16 %v3500_v28  ;;  %v3501_v42 = vunpack.i.l.bf16 %v3500_v28 }
  0xf3   :  { %3453 = vmatpush3.bf16.msra.mxu1 %v3452_v41 }
  0xf4   :  { %v5003_v18 = vsel %vm1944_vm10, %v3501_v42, %v3502_v10  ;;  %v1959_v3 = vsel %vm1944_vm10, %v3502_v10, %v3501_v42  ;;  %v5401_v10 = vld [vmem:[#allocation11_spill] sm:$0xff] }
  0xf5   :  { %3465 = vmatpush3.bf16.msra.mxu0 %v3464_v62  ;;  %v1994_v49 = vrot.slane %v1959_v3, 1  ;;  %v1996_v36 = vrot.slane %v1959_v3, 2  ;;  %v1998_v44 = vrot.slane %v1959_v3, 3  ;;  %v2000_v56 = vrot.slane %v1959_v3, 4  ;;  %v3135_v22 = vpop.f32.mrb[2].mxu1 }
  0xf6   :  { %2550 = vmatmul.mubr.f32.vlgmr.msra.gmra.mrb[16].mxu1 %v4883_v29  ;;  %3467 = vmatprep.subr.bf16.mxu0 %v3466_v17  ;;  %v2002_v20 = vrot.slane %v1959_v3, 5  ;;  %v2004_v37 = vrot.slane %v1959_v3, 6  ;;  %v2006_v57 = vrot.slane %v1959_v3, 7  ;;  %v2118_v15 = vmax.f32 %v5393_v38, %v1959_v3  ;;  %v189_v17 = vpop.f32.mrb[3].mxu1  ;;  %v2897_v38 = vld [vmem:[%s5250_s5 + $0x2f8] sm:$0xff] }
  0xf7   :  { %2554 = vmatprep.mubr.f32.mxu1 %v4889_v54  ;;  %v2120_v55 = vmax.f32 %v5394_v33, %v1994_v49  ;;  %v2122_v60 = vmax.f32 %v5395_v2, %v1996_v36  ;;  %v2124_v13 = vmax.f32 %v5396_v23, %v1998_v44  ;;  %v2126_v43 = vmax.f32 %v5397_v26, %v2000_v56  ;;  %v5402_v49 = vld [vmem:[#allocation13_spill] sm:$0xff]  ;;  %v5403_v44 = vld [vmem:[#allocation15_spill] sm:$0xff] }
  0xf8   :  { %v2128_v8 = vmax.f32 %v5398_v34, %v2002_v20  ;;  %v2130_v0 = vmax.f32 %v5399_v46, %v2004_v37  ;;  %v2132_v31 = vmax.f32 %v5400_v14, %v2006_v57  ;;  %v1993_v25 = vrot.slane %v5003_v18, 1  ;;  %v5404_v20 = vld [vmem:[#allocation17_spill] sm:$0xff]  ;;  %v2896_v57 = vld [vmem:[%s5250_s5 + $0x2f0] sm:$0xff]  ;;  %v5407_v2 = vld [vmem:[#allocation23_spill] sm:$0xff] }
  0xf9   :  { %3469 = vmatpush3.bf16.msra.mxu0 %v3468_v53  ;;  %v2317_v51 = vrot.slane %v2120_v55, 7  ;;  %v2319_v41 = vrot.slane %v2122_v60, 6  ;;  %v2321_v30 = vrot.slane %v2124_v13, 5  ;;  %v2323_v40 = vrot.slane %v2126_v43, 4  ;;  %v5406_v33 = vld [vmem:[#allocation21_spill] sm:$0xff] }
  0xfa   :  { %2555 = vmatmul.mubr.f32.gmra.mrb[18].mxu1 %v4914_v35  ;;  %3471 = vmatprep.subr.bf16.mxu0 %v3470_v63  ;;  %v2325_v52 = vrot.slane %v2128_v8, 3  ;;  %v2327_v6 = vrot.slane %v2130_v0, 2  ;;  %v2329_v24 = vrot.slane %v2132_v31, 1  ;;  %v1995_v47 = vrot.slane %v5003_v18, 2  ;;  %v5408_v13 = vld [vmem:[#allocation25_spill] sm:$0xff] }
  0xfb   :  { %v2318_v7 = vsel %vm1865_vm2, %v2317_v51, %v2118_v15  ;;  %v1997_v21 = vrot.slane %v5003_v18, 3  ;;  %v1999_v59 = vrot.slane %v5003_v18, 4  ;;  %v2001_v62 = vrot.slane %v5003_v18, 5 }
  0xfc   :  { %v2320_v28 = vsel %vm1867_vm3, %v2319_v41, %v2318_v7  ;;  %v2003_v53 = vrot.slane %v5003_v18, 6  ;;  %v2005_v63 = vrot.slane %v5003_v18, 7  ;;  %v2117_v42 = vmax.f32 %v5401_v10, %v5003_v18 }
  0xfd   :  { %3473 = vmatpush3.bf16.msra.mxu0 %v3472_v61  ;;  %v2322_v3 = vsel %vm1869_vm4, %v2321_v30, %v2320_v28  ;;  %v2119_v36 = vmax.f32 %v5402_v49, %v1993_v25  ;;  %v2121_v56 = vmax.f32 %v5403_v44, %v1995_v47  ;;  %v2123_v37 = vmax.f32 %v5404_v20, %v1997_v21  ;;  %v5405_v61 = vld [vmem:[#allocation19_spill] sm:$0xff]  ;;  %v5410_v49 = vld [vmem:[#allocation30_spill] sm:$0xff]  ;;  %v5411_v44 = vld [vmem:[#allocation32_spill] sm:$0xff] }
  0xfe   :  { %3475 = vmatprep.subr.bf16.mxu0 %v3474_v50  ;;  %v2324_v18 = vsel %vm1871_vm5, %v2323_v40, %v2322_v3  ;;  %v2125_v15 = vmax.f32 %v5405_v61, %v1999_v59  ;;  %v2127_v55 = vmax.f32 %v5406_v33, %v2001_v62  ;;  %v2129_v60 = vmax.f32 %v5407_v2, %v2003_v53  ;;  %v5412_v20 = vld [vmem:[#allocation34_spill] sm:$0xff] }
  0xff   :  { %v2326_v23 = vsel %vm1873_vm6, %v2325_v52, %v2324_v18  ;;  %v2131_v50 = vmax.f32 %v5408_v13, %v2005_v63  ;;  %v2303_v26 = vrot.slane %v2119_v36, 7  ;;  %v2305_v43 = vrot.slane %v2121_v56, 6  ;;  %v5414_v18 = vld [vmem:[#allocation38_spill] sm:$0xff] }
 0x100   :  { %v2328_v34 = vsel %vm1875_vm7, %v2327_v6, %v2326_v23  ;;  %v2307_v8 = vrot.slane %v2123_v37, 5  ;;  %v2309_v46 = vrot.slane %v2125_v15, 4  ;;  %v3482_v0 = vpack.c.bf16 %v2897_v38, %v2896_v57  ;;  %v5413_v57 = vld [vmem:[#allocation36_spill] sm:$0xff] }
 0x101   :  { %3477 = vmatpush3.bf16.msra.mxu0 %v3476_v1  ;;  %v5050_v14 = vsel %vm1877_vm8, %v2329_v24, %v2328_v34  ;;  %v2304_v31 = vsel %vm1865_vm2, %v2303_v26, %v2117_v42  ;;  %v2311_v25 = vrot.slane %v2127_v55, 3  ;;  %v2313_v51 = vrot.slane %v2129_v60, 2  ;;  %v5409_v42 = vld [vmem:[#allocation28_spill] sm:$0xff]  ;;  %v5416_v55 = vld [vmem:[#allocation42_spill] sm:$0xff] }
 0x102   :  { %3479 = vmatprep.subr.bf16.mxu0 %v3478_v27  ;;  %2441 = vmatprep.mubr.f32.mxu0 %v5050_v14  ;;  %v2306_v41 = vsel %vm1867_vm3, %v2305_v43, %v2304_v31  ;;  %v396_v1 = vrot.slane %v3135_v22, 7  ;;  %v394_v30 = vrot.slane %v189_v17, 7  ;;  %v2315_v39 = vrot.slane %v2131_v50, 1  ;;  %v5415_v15 = vld [vmem:[#allocation40_spill] sm:$0xff] }
 0x103   :  { %2559 = vmatprep.mubr.f32.mxu1 %v5050_v14  ;;  %v2308_v5 = vsel %vm1869_vm4, %v2307_v8, %v2306_v41  ;;  %v5071_v27 = vsel %vm390_vm11, %v391_v58, %v392_v45  ;;  %v3484_v47 = vpack.c.bf16 %v2881_v16, %v2880_v12  ;;  %v5417_v16 = vld [vmem:[#allocation27_spill] sm:$0xff] }
 0x104   :  { %v2310_v40 = vsel %vm1871_vm5, %v2309_v46, %v2308_v5  ;;  %v5078_v52 = vsel %vm390_vm11, %v394_v30, %v396_v1  ;;  %v5083_v6 = vsel %vm390_vm11, %v392_v45, %v394_v30  ;;  %v5418_v5 = vld [vmem:[#allocation29_spill] sm:$0xff] }
 0x105   :  { %3481 = vmatpush3.bf16.msra.mxu0 %v3480_v4  ;;  %v2312_v24 = vsel %vm1873_vm6, %v2311_v25, %v2310_v40  ;;  %v5419_v40 = vld [vmem:[#allocation31_spill] sm:$0xff] }
 0x106   :  { %3483 = vmatprep.subr.bf16.mxu0 %v3482_v0  ;;  %v2314_v22 = vsel %vm1875_vm7, %v2313_v51, %v2312_v24 }
 0x107   :  { %v5088_v7 = vsel %vm1877_vm8, %v2315_v39, %v2314_v22 }
 0x108   :  { %2442 = vmatmul.mubr.f32.gmra.mrb[12].mxu0 %v5088_v7  ;;  %2560 = vmatmul.mubr.f32.gmra.mrb[20].mxu1 %v5088_v7 }
 0x109   :  { %3485 = vmatpush3.bf16.msra.mxu0 %v3484_v47  ;;  %v5420_v47 = vld [vmem:[#allocation33_spill] sm:$0xff] }
 0x117   :  { %v3505_v19 = vpop.permute.xlu1 %3504 }
 0x118   :  { %v3507_v48 = vunpack.i.h.bf16 %v3505_v19  ;;  %v3506_v11 = vunpack.i.l.bf16 %v3505_v19 }
 0x11a   :  { %v1948_v4 = vsel %vm1944_vm10, %v3506_v11, %v3507_v48  ;;  %v1960_v45 = vsel %vm1944_vm10, %v3507_v48, %v3506_v11  ;;  %v5421_v48 = vld [vmem:[#allocation35_spill] sm:$0xff] }
 0x11b   :  { %v2007_v21 = vrot.slane %v1948_v4, 1  ;;  %v2008_v59 = vrot.slane %v1960_v45, 1  ;;  %v2010_v62 = vrot.slane %v1960_v45, 2  ;;  %v2012_v17 = vrot.slane %v1960_v45, 3 }
 0x11c   :  { %v2014_v28 = vrot.slane %v1960_v45, 4  ;;  %v2016_v53 = vrot.slane %v1960_v45, 5  ;;  %v2018_v63 = vrot.slane %v1960_v45, 6  ;;  %v2020_v10 = vrot.slane %v1960_v45, 7 }
 0x11d   :  { %v2134_v3 = vmax.f32 %v5409_v42, %v1960_v45  ;;  %v2136_v36 = vmax.f32 %v5410_v49, %v2008_v59  ;;  %v2138_v56 = vmax.f32 %v5411_v44, %v2010_v62  ;;  %v2140_v37 = vmax.f32 %v5412_v20, %v2012_v17  ;;  %v5422_v45 = vld [vmem:[#allocation37_spill] sm:$0xff]  ;;  %v5423_v62 = vld [vmem:[#allocation39_spill] sm:$0xff] }
 0x11e   :  { %v2142_v38 = vmax.f32 %v5413_v57, %v2014_v28  ;;  %v2144_v61 = vmax.f32 %v5414_v18, %v2016_v53  ;;  %v2146_v33 = vmax.f32 %v5415_v15, %v2018_v63  ;;  %v2148_v2 = vmax.f32 %v5416_v55, %v2020_v10  ;;  %v5424_v53 = vld [vmem:[#allocation41_spill] sm:$0xff] }
 0x11f   :  { %v2345_v60 = vrot.slane %v2136_v36, 7  ;;  %v2347_v23 = vrot.slane %v2138_v56, 6  ;;  %v2349_v13 = vrot.slane %v2140_v37, 5  ;;  %v2009_v50 = vrot.slane %v1948_v4, 2 }
 0x120   :  { %v2351_v26 = vrot.slane %v2142_v38, 4  ;;  %v2353_v43 = vrot.slane %v2144_v61, 3  ;;  %v2355_v34 = vrot.slane %v2146_v33, 2  ;;  %v2357_v8 = vrot.slane %v2148_v2, 1  ;;  %v5425_v33 = vld [vmem:[#allocation2_spill] sm:$0xff] }
 0x121   :  { %v2346_v46 = vsel %vm1865_vm2, %v2345_v60, %v2134_v3  ;;  %v2011_v0 = vrot.slane %v1948_v4, 3  ;;  %v2013_v31 = vrot.slane %v1948_v4, 4  ;;  %v2015_v25 = vrot.slane %v1948_v4, 5 }
 0x122   :  { %v2348_v51 = vsel %vm1867_vm3, %v2347_v23, %v2346_v46  ;;  %v2017_v41 = vrot.slane %v1948_v4, 6  ;;  %v2019_v12 = vrot.slane %v1948_v4, 7  ;;  %v2133_v1 = vmax.f32 %v5417_v16, %v1948_v4 }
 0x123   :  { %v2350_v30 = vsel %vm1869_vm4, %v2349_v13, %v2348_v51  ;;  %v2135_v39 = vmax.f32 %v5418_v5, %v2007_v21  ;;  %v2137_v24 = vmax.f32 %v5419_v40, %v2009_v50  ;;  %v2139_v22 = vmax.f32 %v5420_v47, %v2011_v0 }
 0x124   :  { %v2352_v19 = vsel %vm1871_vm5, %v2351_v26, %v2350_v30  ;;  %v2141_v11 = vmax.f32 %v5421_v48, %v2013_v31  ;;  %v2143_v59 = vmax.f32 %v5422_v45, %v2015_v25  ;;  %v2145_v17 = vmax.f32 %v5423_v62, %v2017_v41 }
 0x125   :  { %v2354_v28 = vsel %vm1873_vm6, %v2353_v43, %v2352_v19  ;;  %v2147_v4 = vmax.f32 %v5424_v53, %v2019_v12  ;;  %v2331_v63 = vrot.slane %v2135_v39, 7  ;;  %v2333_v10 = vrot.slane %v2137_v24, 6 }
 0x126   :  { %v2356_v21 = vsel %vm1875_vm7, %v2355_v34, %v2354_v28  ;;  %v2335_v42 = vrot.slane %v2139_v22, 5  ;;  %v2337_v3 = vrot.slane %v2141_v11, 4  ;;  %v2339_v44 = vrot.slane %v2143_v59, 3 }
 0x127   :  { %v2358_v49 = vsel %vm1877_vm8, %v2357_v8, %v2356_v21  ;;  %v2332_v36 = vsel %vm1865_vm2, %v2331_v63, %v2133_v1  ;;  %v2341_v20 = vrot.slane %v2145_v17, 2  ;;  %v2343_v57 = vrot.slane %v2147_v4, 1 }
 0x128   :  { %2446 = vmatprep.mubr.f32.mxu0 %v2358_v49  ;;  %v2334_v56 = vsel %vm1867_vm3, %v2333_v10, %v2332_v36  ;;  %2564 = vmatprep.mubr.f32.mxu1 %v2358_v49  ;;  %v35_v55 = vand.u32 15, %v5425_v33  ;;  %v29_v2 = vadd.s32 16, %v5425_v33  ;;  %v30_v34 = vadd.s32 24, %v5425_v33 }
 0x129   :  { %v2336_v37 = vsel %vm1869_vm4, %v2335_v42, %v2334_v56  ;;  %v28_v8 = vadd.s32 8, %v5425_v33  ;;  %v5175_v36 = vsub.s32 0, %v5425_v33  ;;  %v91_v56 = vld [vmem:[%s5251_s6] sm:$0x3] }
 0x12a   :  { %v2338_v38 = vsel %vm1871_vm5, %v2337_v3, %v2336_v37  ;;  %vm5132_vm12 = vcmp.ne.s32.totalorder %v35_v55, 0  ;;  %v56_v31 = vand.u32 15, %v30_v34 }
 0x12b   :  { %v2340_v18 = vsel %vm1873_vm6, %v2339_v44, %v2338_v38  ;;  %v42_v51 = vand.u32 15, %v28_v8 }
 0x12c   :  { %v2342_v61 = vsel %vm1875_vm7, %v2341_v20, %v2340_v18  ;;  %vm5153_vm15 = vcmp.ne.s32.totalorder %v56_v31, 15  ;;  %v455_v18 = vrot.slane %v91_v56, %v5175_v36 }
 0x12d   :  { %v2344_v15 = vsel %vm1877_vm8, %v2343_v57, %v2342_v61  ;;  %vm5157_vm0 = vcmp.ne.s32.totalorder %v42_v51, 15  ;;  %v5184_v61 = vsub.s32 1, %v5425_v33 }
 0x12e   :  { %2447 = vmatmul.mubr.f32.gmra.mrb[14].mxu0 %v2344_v15  ;;  %2565 = vmatmul.mubr.f32.gmra.mrb[22].mxu1 %v2344_v15 }
 0x12f   :  { %2667 = vmatprep.mubr.f32.mxu0 %v4637_v9  ;;  %v402_v9 = vsel %vm390_vm11, 0.0, %v391_v58 }
 0x132   :  { %2668 = vmatmul.mubr.f32.vlgmr.msra.gmra.mrb[16].mxu0 %v4883_v29  ;;  %v49_v29 = vand.u32 15, %v29_v2 }
 0x133   :  { %2672 = vmatprep.mubr.f32.mxu0 %v4889_v54  ;;  %v428_v54 = vsel %vm5132_vm12, %v402_v9, 0.0 }
 0x134   :  { %vm5141_vm13 = vcmp.ne.s32.totalorder %v49_v29, 0 }
 0x135   :  { %v430_v50 = vsel %vm5141_vm13, %v5083_v6, 0.0 }
 0x136   :  { %2673 = vmatmul.mubr.f32.gmra.mrb[18].mxu0 %v4914_v35 }
 0x137   :  { %2677 = vmatprep.mubr.f32.mxu0 %v5050_v14  ;;  %v2833_v14 = vld [vmem:[%s5251_s6 + $0x4] sm:$0x3] }
 0x13a   :  { %2678 = vmatmul.mubr.f32.gmra.mrb[20].mxu0 %v5088_v7 }
 0x13b   :  { %2682 = vmatprep.mubr.f32.mxu0 %v2358_v49 }
 0x13e   :  { %2683 = vmatmul.mubr.f32.gmra.mrb[22].mxu0 %v2344_v15 }
 0x176   :  { %v3154_v35 = vpop.f32.mrb[4].mxu1 }
 0x177   :  { %v433_v7 = vadd.f32 %v3154_v35, %v5071_v27  ;;  %v273_v23 = vpop.f32.mrb[5].mxu1 }
 0x178   :  { %v432_v13 = vadd.f32 %v428_v54, %v273_v23  ;;  %v463_v54 = vrot.slane %v91_v56, %v5184_v61 }
 0x17a   :  { %v3157_v32 = vpop.f32.mrb[6].mxu1 }
 0x17b   :  { %v435_v58 = vadd.f32 %v3157_v32, %v5078_v52  ;;  %v283_v26 = vpop.f32.mrb[7].mxu1 }
 0x17c   :  { %v434_v43 = vadd.f32 %v430_v50, %v283_v26 }
 0x186   :  { %v3176_v46 = vpop.f32.mrb[0].mxu0 }
 0x187   :  { %v367_v0 = vpop.f32.mrb[1].mxu0  ;;  %v409_v25 = vrot.slane %v3176_v46, 1 }
 0x188   :  { %v408_v27 = vrot.slane %v367_v0, 1 }
 0x18a   :  { %v410_v41 = vsel %vm407_vm14, %v408_v27, %v409_v25  ;;  %v3179_v12 = vpop.f32.mrb[2].mxu0 }
 0x18b   :  { %v448_v6 = vadd.f32 %v432_v13, %v410_v41  ;;  %v413_v52 = vrot.slane %v3179_v12, 1  ;;  %v377_v1 = vpop.f32.mrb[3].mxu0 }
 0x18c   :  { %v411_v5 = vrot.slane %v377_v1, 1 }
 0x18d   :  { %v419_v39 = vsel %vm407_vm14, %v413_v52, 0.0  ;;  %v456_v29 = vmul.f32 %v455_v18, %v448_v6 }
 0x18e   :  { %v447_v40 = vsel %vm5153_vm15, %v419_v39, 0.0  ;;  %v412_v24 = vsel %vm407_vm14, %v409_v25, %v411_v5  ;;  %v414_v47 = vsel %vm407_vm14, %v411_v5, %v413_v52 }
 0x18f   :  { %v3206_v22 = vpop.f32.mrb[8].mxu1  ;;  %v451_v19 = vadd.f32 %v447_v40, %v435_v58  ;;  %v445_v48 = vsel %vm5157_vm0, %v412_v24, 0.0  ;;  %v450_v11 = vadd.f32 %v434_v43, %v414_v47  ;;  %v464_v32 = vadd.f32 %v463_v54, %v456_v29 }
 0x190   :  { %v789_v45 = vrot.slane %v3206_v22, 7  ;;  %v569_v59 = vpop.f32.mrb[9].mxu1  ;;  %v449_v62 = vadd.f32 %v445_v48, %v433_v7  ;;  %v2796_v7 = vld [vmem:[%s5251_s6 + $0x2] sm:$0x3] }
 0x191   :  { %v788_v17 = vrot.slane %v569_v59, 7  ;;  %v459_v58 = vmul.f32 %v455_v18, %v451_v19  ;;  %v835_v33 = vrot.slane %v2796_v7, %v5175_v36  ;;  %v458_v26 = vmul.f32 %v455_v18, %v450_v11 }
 0x192   :  { %v843_v0 = vrot.slane %v2796_v7, %v5184_v61  ;;  %v457_v25 = vmul.f32 %v455_v18, %v449_v62  ;;  %v468_v51 = vmax.f32 %v464_v32, 0.0 }
 0x193   :  { %v3209_v28 = vpop.f32.mrb[10].mxu1  ;;  %v790_v53 = vsel %vm390_vm11, %v788_v17, %v789_v45  ;;  %v799_v3 = vsel %vm390_vm11, 0.0, %v788_v17  ;;  %v467_v41 = vadd.f32 %v463_v54, %v459_v58  ;;  %v466_v52 = vadd.f32 %v463_v54, %v458_v26 }
 0x194   :  { %v793_v4 = vrot.slane %v3209_v28, 7  ;;  %v579_v63 = vpop.f32.mrb[11].mxu1  ;;  %v816_v49 = vsel %vm5132_vm12, %v799_v3, 0.0  ;;  %v465_v19 = vadd.f32 %v463_v54, %v457_v25 }
 0x195   :  { %v791_v10 = vrot.slane %v579_v63, 7  ;;  %v471_v62 = vmax.f32 %v467_v41, 0.0  ;;  %v470_v28 = vmax.f32 %v466_v52, 0.0 }
 0x197   :  { %v794_v21 = vsel %vm390_vm11, %v791_v10, %v793_v4  ;;  %v792_v42 = vsel %vm390_vm11, %v789_v45, %v791_v10  ;;  %v469_v10 = vmax.f32 %v465_v19, 0.0 }
 0x198   :  { %v818_v38 = vsel %vm5141_vm13, %v792_v42, 0.0 }
 0x19e   :  { %v3236_v44 = vpop.f32.mrb[4].mxu0 }
 0x19f   :  { %v821_v20 = vadd.f32 %v3236_v44, %v790_v53  ;;  %v667_v37 = vpop.f32.mrb[5].mxu0 }
 0x1a0   :  { %v820_v57 = vadd.f32 %v816_v49, %v667_v37 }
 0x1a2   :  { %v3239_v15 = vpop.f32.mrb[6].mxu0 }
 0x1a3   :  { %v823_v55 = vadd.f32 %v3239_v15, %v794_v21  ;;  %v677_v2 = vpop.f32.mrb[7].mxu0 }
 0x1a4   :  { %v822_v9 = vadd.f32 %v818_v38, %v677_v2 }
 0x1a7   :  { %v3266_v35 = vpop.f32.mrb[12].mxu1 }
 0x1a8   :  { %v765_v23 = vpop.f32.mrb[13].mxu1  ;;  %v805_v13 = vrot.slane %v3266_v35, 1 }
 0x1a9   :  { %v804_v50 = vrot.slane %v765_v23, 1 }
 0x1ab   :  { %v3269_v43 = vpop.f32.mrb[14].mxu1  ;;  %v806_v34 = vsel %vm407_vm14, %v804_v50, %v805_v13 }
 0x1ac   :  { %v809_v8 = vrot.slane %v3269_v43, 1  ;;  %v775_v46 = vpop.f32.mrb[15].mxu1  ;;  %v828_v31 = vadd.f32 %v820_v57, %v806_v34 }
 0x1ad   :  { %v807_v27 = vrot.slane %v775_v46, 1 }
 0x1ae   :  { %v815_v12 = vsel %vm407_vm14, %v809_v8, 0.0  ;;  %v836_v6 = vmul.f32 %v835_v33, %v828_v31 }
 0x1af   :  { %v808_v1 = vsel %vm407_vm14, %v805_v13, %v807_v27  ;;  %v827_v5 = vsel %vm5153_vm15, %v815_v12, 0.0  ;;  %v810_v39 = vsel %vm407_vm14, %v807_v27, %v809_v8 }
 0x1b0   :  { %v825_v40 = vsel %vm5157_vm0, %v808_v1, 0.0  ;;  %v844_v24 = vadd.f32 %v843_v0, %v836_v6  ;;  %v831_v47 = vadd.f32 %v827_v5, %v823_v55  ;;  %v830_v22 = vadd.f32 %v822_v9, %v810_v39 }
 0x1b1   :  { %v829_v48 = vadd.f32 %v825_v40, %v821_v20 }
 0x1b2   :  { %v848_v11 = vmax.f32 %v844_v24, 0.0  ;;  %v839_v45 = vmul.f32 %v835_v33, %v831_v47  ;;  %v838_v59 = vmul.f32 %v835_v33, %v830_v22 }
 0x1b3   :  { %v837_v17 = vmul.f32 %v835_v33, %v829_v48 }
 0x1b4   :  { %v5200_v53 = vadd.f32 %v848_v11, %v468_v51  ;;  %v847_v4 = vadd.f32 %v843_v0, %v839_v45  ;;  %v846_v63 = vadd.f32 %v843_v0, %v838_v59 }
 0x1b5   :  { %v845_v21 = vadd.f32 %v843_v0, %v837_v17 }
 0x1b6   :  { %v851_v42 = vmax.f32 %v847_v4, 0.0  ;;  %v850_v3 = vmax.f32 %v846_v63, 0.0 }
 0x1b7   :  { %v849_v49 = vmax.f32 %v845_v21, 0.0 }
 0x1b8   :  { %v5202_v44 = vadd.f32 %v851_v42, %v471_v62  ;;  %v5204_v56 = vadd.f32 %v850_v3, %v470_v28  ;;  %v2739_v28 = vrot.slane %v2833_v14, %v5175_v36  ;;  %v2747_v42 = vrot.slane %v2833_v14, %v5184_v61 }
 0x1b9   :  { %v5206_v20 = vadd.f32 %v849_v49, %v469_v10 }
 0x1bf   :  { %v3014_v37 = vpop.f32.mrb[8].mxu0 }
 0x1c0   :  { %v3015_v57 = vpop.f32.mrb[9].mxu0 }
 0x1c1   :  { %v3016_v38 = vadd.f32 %v3015_v57, %v3014_v37 }
 0x1c3   :  { %v2692_v18 = vrot.slane %v3016_v38, 7  ;;  %v3017_v15 = vpop.f32.mrb[10].mxu0 }
 0x1c4   :  { %v3018_v55 = vpop.f32.mrb[11].mxu0 }
 0x1c5   :  { %v3019_v2 = vadd.f32 %v3018_v55, %v3017_v15  ;;  %v2703_v9 = vsel %vm390_vm11, 0.0, %v2692_v18 }
 0x1c6   :  { %v2720_v7 = vsel %vm5132_vm12, %v2703_v9, 0.0 }
 0x1c7   :  { %v2693_v29 = vrot.slane %v3019_v2, 7 }
 0x1c9   :  { %v3058_v54 = vpop.f32.mrb[16].mxu1  ;;  %v2694_v23 = vsel %vm390_vm11, %v2692_v18, %v2693_v29 }
 0x1ca   :  { %v3059_v35 = vpop.f32.mrb[17].mxu1 }
 0x1cb   :  { %v3060_v13 = vadd.f32 %v3059_v35, %v3058_v54 }
 0x1cd   :  { %v2724_v50 = vadd.f32 %v3060_v13, %v2720_v7  ;;  %v3061_v32 = vpop.f32.mrb[18].mxu1 }
 0x1ce   :  { %v3062_v58 = vpop.f32.mrb[19].mxu1 }
 0x1cf   :  { %v3063_v33 = vadd.f32 %v3062_v58, %v3061_v32 }
 0x1d1   :  { %v2725_v26 = vadd.f32 %v3063_v33, %v2694_v23 }
 0x1db   :  { %v3020_v43 = vpop.f32.mrb[12].mxu0  ;;  %v3064_v34 = vpop.f32.mrb[20].mxu1 }
 0x1dc   :  { %v3021_v8 = vpop.f32.mrb[13].mxu0  ;;  %v3065_v46 = vpop.f32.mrb[21].mxu1 }
 0x1dd   :  { %v3022_v0 = vadd.f32 %v3021_v8, %v3020_v43  ;;  %v3066_v31 = vadd.f32 %v3065_v46, %v3064_v34 }
 0x1df   :  { %v2695_v25 = vrot.slane %v3022_v0, 7 }
 0x1e1   :  { %v2696_v27 = vsel %vm390_vm11, %v2693_v29, %v2695_v25 }
 0x1e2   :  { %v2722_v60 = vsel %vm5141_vm13, %v2696_v27, 0.0 }
 0x1e3   :  { %v2726_v51 = vadd.f32 %v3066_v31, %v2722_v60 }
 0x201   :  { %v3023_v41 = vpop.f32.mrb[14].mxu0  ;;  %v3067_v12 = vpop.f32.mrb[22].mxu1 }
 0x202   :  { %v3024_v6 = vpop.f32.mrb[15].mxu0  ;;  %v3068_v52 = vpop.f32.mrb[23].mxu1 }
 0x203   :  { %v3025_v1 = vadd.f32 %v3024_v6, %v3023_v41  ;;  %v3069_v5 = vadd.f32 %v3068_v52, %v3067_v12 }
 0x205   :  { %v2697_v39 = vrot.slane %v3025_v1, 7  ;;  %v3102_v40 = vpop.f32.mrb[16].mxu0 }
 0x206   :  { %v3103_v24 = vpop.f32.mrb[17].mxu0 }
 0x207   :  { %v2698_v47 = vsel %vm390_vm11, %v2695_v25, %v2697_v39  ;;  %v3104_v22 = vadd.f32 %v3103_v24, %v3102_v40 }
 0x208   :  { %v2727_v19 = vadd.f32 %v3069_v5, %v2698_v47 }
 0x209   :  { %v3105_v48 = vpop.f32.mrb[18].mxu0  ;;  %v2708_v59 = vrot.slane %v3104_v22, 1 }
 0x20a   :  { %v3106_v11 = vpop.f32.mrb[19].mxu0 }
 0x20b   :  { %v3107_v45 = vadd.f32 %v3106_v11, %v3105_v48 }
 0x20d   :  { %v2709_v62 = vrot.slane %v3107_v45, 1  ;;  %v3108_v17 = vpop.f32.mrb[20].mxu0 }
 0x20e   :  { %v3109_v4 = vpop.f32.mrb[21].mxu0 }
 0x20f   :  { %v2710_v63 = vsel %vm407_vm14, %v2708_v59, %v2709_v62  ;;  %v3110_v10 = vadd.f32 %v3109_v4, %v3108_v17 }
 0x210   :  { %v2732_v21 = vadd.f32 %v2724_v50, %v2710_v63 }
 0x211   :  { %v2711_v3 = vrot.slane %v3110_v10, 1  ;;  %v3111_v49 = vpop.f32.mrb[22].mxu0 }
 0x212   :  { %v2740_v37 = vmul.f32 %v2739_v28, %v2732_v21  ;;  %v3112_v57 = vpop.f32.mrb[23].mxu0 }
 0x213   :  { %v2712_v38 = vsel %vm407_vm14, %v2709_v62, %v2711_v3  ;;  %v3113_v18 = vadd.f32 %v3112_v57, %v3111_v49 }
 0x214   :  { %v2748_v15 = vadd.f32 %v2747_v42, %v2740_v37  ;;  %v2729_v55 = vsel %vm5157_vm0, %v2712_v38, 0.0 }
 0x215   :  { %v2733_v2 = vadd.f32 %v2729_v55, %v2725_v26  ;;  %v2713_v36 = vrot.slane %v3113_v18, 1 }
 0x216   :  { %v2752_v9 = vmax.f32 %v2748_v15, 0.0 }
 0x217   :  { %v2741_v29 = vmul.f32 %v2739_v28, %v2733_v2  ;;  %v2714_v54 = vsel %vm407_vm14, %v2711_v3, %v2713_v36  ;;  %v2719_v35 = vsel %vm407_vm14, %v2713_v36, 0.0 }
 0x218   :  { %v2756_v61 = vadd.f32 %v2752_v9, %v5200_v53  ;;  %v2731_v7 = vsel %vm5153_vm15, %v2719_v35, 0.0  ;;  %v2734_v23 = vadd.f32 %v2726_v51, %v2714_v54 }
 0x219   :  { %v2749_v13 = vadd.f32 %v2747_v42, %v2741_v29  ;;  %v2735_v50 = vadd.f32 %v2731_v7, %v2727_v19 }
 0x21a   :  { %2760 = vst [vmem:[%s5252_s7] sm:$0xff] %v2756_v61  ;;  %v2742_v30 = vmul.f32 %v2739_v28, %v2734_v23 }
 0x21b   :  { %v2753_v32 = vmax.f32 %v2749_v13, 0.0  ;;  %v2743_v58 = vmul.f32 %v2739_v28, %v2735_v50 }
 0x21c   :  { %v2750_v33 = vadd.f32 %v2747_v42, %v2742_v30 }
 0x21d   :  { %v2757_v26 = vadd.f32 %v2753_v32, %v5206_v20  ;;  %v2751_v43 = vadd.f32 %v2747_v42, %v2743_v58 }
 0x21e   :  { %v2754_v34 = vmax.f32 %v2750_v33, 0.0 }
 0x21f   :  { %2761 = vst [vmem:[%s5252_s7 + $0x8] sm:$0xff] %v2757_v26  ;;  %v2755_v16 = vmax.f32 %v2751_v43, 0.0 }
 0x220   :  { %v2758_v53 = vadd.f32 %v2754_v34, %v5204_v56 }
 0x221   :  { %v2759_v8 = vadd.f32 %v2755_v16, %v5202_v44 }
 0x222   :  { %2762 = vst [vmem:[%s5252_s7 + $0x10] sm:$0xff] %v2758_v53 }
 0x223   :  { %2763 = vst [vmem:[%s5252_s7 + $0x18] sm:$0xff] %v2759_v8 }

</bundles_post_ra>
